<compile_context>
chip_gen: v7x
topology: tpu7x:2x2x1
jax: 0.10.0
libtpu: 0.0.40
codegen_flags: <defaults>
</compile_context>

<pallas_src>
import functools

import jax
import jax.numpy as jnp
from jax.experimental import pallas as pl
from jax.experimental.pallas import tpu as pltpu

# Layer dimensions from Method_MLP.__init__ and their lane-padded versions.
DIMS = (784, 400, 200, 100, 30, 10)
PAD_DIMS = (784, 512, 256, 128, 128, 128)   # input dim left unpadded on purpose


def _round_up(n, m):
    return ((n + m - 1) // m) * m


def _mlp_kernel(x_ref,
                w1_ref, b1_ref,
                w2_ref, b2_ref,
                w3_ref, b3_ref,
                w4_ref, b4_ref,
                w5_ref, b5_ref,
                o_ref):
    """Fused 5-layer MLP: bf16 MXU matmuls with f32 accumulation.

    Bias-add + ReLU run in f32; the bf16 cast is fused into the ReLU so the
    inter-layer activation that round-trips through VMEM is half-width.
    """
    h = x_ref[...]                                        # (tile, 784) bf16
    for w_ref, b_ref in ((w1_ref, b1_ref), (w2_ref, b2_ref), (w3_ref, b3_ref),
                         (w4_ref, b4_ref), (w5_ref, b5_ref)):
        acc = jnp.dot(h, w_ref[...], preferred_element_type=jnp.float32)
        h = jnp.maximum(acc + b_ref[...], 0.0).astype(jnp.bfloat16)
    o_ref[...] = h                                        # (tile, 128) bf16


def _const_block_spec(shape):
    """BlockSpec for a grid-invariant operand; single-buffered when supported."""
    if hasattr(pl, "Buffered"):
        try:
            return pl.BlockSpec(shape, lambda i: (0, 0),
                                pipeline_mode=pl.Buffered(1))
        except TypeError:
            pass
    return pl.BlockSpec(shape, lambda i: (0, 0))


def _choose_tile(batch, batch_tile):
    """Pick the batch tile: multiple of 16 (bf16 sublane packing), capped at
    the padded batch, and split so the parallel grid axis has >= 2 steps when
    the batch is big enough (keeps both v7x TensorCores busy)."""
    b16 = _round_up(batch, 16)
    tile = min(batch_tile, b16)
    if batch >= 32 and _round_up(batch, tile) // tile < 2:
        tile = _round_up(-(-b16 // 2), 16)   # ceil(b16/2), rounded up to 16
    return tile


@functools.partial(jax.jit, static_argnames=("batch_tile",))
def mlp_forward(x, params, *, batch_tile=1024):
    """x: (B, 784) f32.  params: list of 5 (W (in,out) f32, b (1,out) f32)."""
    B = x.shape[0]
    assert batch_tile % 16 == 0, "batch_tile must be a multiple of 16"

    tile = _choose_tile(B, batch_tile)
    Bp = _round_up(B, tile)

    # Producer-side cast + batch padding of the input (padding rows discarded).
    xb = x.astype(jnp.bfloat16)
    if Bp != B:
        xb = jnp.pad(xb, ((0, Bp - B), (0, 0)))

    # Zero-pad every weight/bias to lane-dense (multiple-of-128) widths.  The
    # zeros propagate exactly through ReLU and the following matmul, so the
    # numerical result is unchanged.
    in_specs = [pl.BlockSpec((tile, PAD_DIMS[0]), lambda i: (i, 0))]
    flat_params = []
    for li, (w, b) in enumerate(params):
        pin, pout = PAD_DIMS[li], PAD_DIMS[li + 1]
        wb = jnp.pad(w.astype(jnp.bfloat16),
                     ((0, pin - w.shape[0]), (0, pout - w.shape[1])))
        bb = jnp.pad(b.astype(jnp.float32), ((0, 0), (0, pout - b.shape[1])))
        in_specs.append(_const_block_spec((pin, pout)))
        in_specs.append(_const_block_spec((1, pout)))
        flat_params.extend([wb, bb])

    out_spec = pl.BlockSpec((tile, PAD_DIMS[-1]), lambda i: (i, 0))

    y = pl.pallas_call(
        _mlp_kernel,
        out_shape=jax.ShapeDtypeStruct((Bp, PAD_DIMS[-1]), jnp.bfloat16),
        grid_spec=pltpu.PrefetchScalarGridSpec(
            num_scalar_prefetch=0,
            grid=(Bp // tile,),
            in_specs=in_specs,
            out_specs=out_spec,
        ),
        compiler_params=pltpu.CompilerParams(
            dimension_semantics=("parallel",),
            vmem_limit_bytes=32 * 1024 * 1024,
        ),
    )(xb, *flat_params)

    # Drop batch padding / padded output lanes; return f32 like the PyTorch module.
    return y[:B, :DIMS[-1]].astype(jnp.float32)


def init_params(key):
    """Deterministic init mimicking torch.nn.Linear default U[-1/sqrt(fan_in), +]."""
    params = []
    for fan_in, fan_out in zip(DIMS[:-1], DIMS[1:]):
        key, kw, kb = jax.random.split(key, 3)
        bound = 1.0 / (fan_in ** 0.5)
        w = jax.random.uniform(kw, (fan_in, fan_out), jnp.float32, -bound, bound)
        b = jax.random.uniform(kb, (1, fan_out), jnp.float32, -bound, bound)
        params.append((w, b))
    return params


def reference_forward_bf16(x, params):
    """Plain-JAX mirror of the kernel's compute path (bf16 matmul, f32 acc)."""
    h = x.astype(jnp.bfloat16)
    for w, b in params:
        acc = jnp.dot(h, w.astype(jnp.bfloat16),
                      preferred_element_type=jnp.float32)
        h = jnp.maximum(acc + b, 0.0).astype(jnp.bfloat16)
    return h.astype(jnp.float32)


def reference_forward_f32(x, params):
    """Full-precision reference matching the PyTorch module's forward."""
    h = x
    for w, b in params:
        h = jnp.maximum(jnp.dot(h, w) + b, 0.0)
    return h


if __name__ == "__main__":
    key = jax.random.PRNGKey(0)
    key, kx1, kx2 = jax.random.split(key, 3)
    params = init_params(key)

    # Small batch (single grid step).
    x_small = jax.random.normal(kx1, (8, DIMS[0]), jnp.float32)
    y_small = mlp_forward(x_small, params)
    jax.block_until_ready(y_small)
    assert y_small.shape == (8, DIMS[-1])
    assert jnp.allclose(y_small, reference_forward_bf16(x_small, params),
                        atol=5e-3, rtol=5e-3), "small-batch mismatch vs bf16 reference"

    # Batch that is not a multiple of the tile: exercises batch padding and
    # the >=2-step parallel grid (tile auto-split for v7x's two TensorCores).
    x_med = jax.random.normal(kx2, (300, DIMS[0]), jnp.float32)
    y_med = mlp_forward(x_med, params)
    jax.block_until_ready(y_med)
    assert y_med.shape == (300, DIMS[-1])
    assert jnp.allclose(y_med, reference_forward_bf16(x_med, params),
                        atol=5e-3, rtol=5e-3), "medium-batch mismatch vs bf16 reference"
    # Loose sanity check vs. the full-f32 PyTorch-equivalent forward
    # (bf16 matmul precision is the only expected deviation).
    assert jnp.allclose(y_med, reference_forward_f32(x_med, params),
                        atol=1e-1, rtol=1e-1), "medium-batch mismatch vs f32 reference"

    # TODO(synk): training loop (Adam, CrossEntropyLoss) from Method_MLP.train
    # is out of scope for the forward-pass kernel.
    print("KERNEL_OK")
</pallas_src>

<mosaic_0001>
module attributes {stable_mosaic.version = 11 : i64} {
  func.func @_mlp_kernel(%arg0: i32, %arg1: memref<16x784xbf16, #tpu.memory_space<vmem>>, %arg2: memref<784x512xbf16, #tpu.memory_space<vmem>>, %arg3: memref<1x512xf32, #tpu.memory_space<vmem>>, %arg4: memref<512x256xbf16, #tpu.memory_space<vmem>>, %arg5: memref<1x256xf32, #tpu.memory_space<vmem>>, %arg6: memref<256x128xbf16, #tpu.memory_space<vmem>>, %arg7: memref<1x128xf32, #tpu.memory_space<vmem>>, %arg8: memref<128x128xbf16, #tpu.memory_space<vmem>>, %arg9: memref<1x128xf32, #tpu.memory_space<vmem>>, %arg10: memref<128x128xbf16, #tpu.memory_space<vmem>>, %arg11: memref<1x128xf32, #tpu.memory_space<vmem>>, %arg12: memref<16x128xbf16, #tpu.memory_space<vmem>>) attributes {dimension_semantics = [#tpu.dimension_semantics<parallel>], iteration_bounds = array<i64: 1>, scalar_prefetch = 0 : i64, scratch_operands = 0 : i64, tpu.core_type = #tpu.core_type<tc>, window_params = [{transform_indices = @transform_0, window_bounds = array<i64: 16, 784>}, {pipeline_mode = #tpu.pipeline_mode<synchronous>, transform_indices = @transform_1, window_bounds = array<i64: 784, 512>}, {pipeline_mode = #tpu.pipeline_mode<synchronous>, transform_indices = @transform_2, window_bounds = array<i64: 1, 512>}, {pipeline_mode = #tpu.pipeline_mode<synchronous>, transform_indices = @transform_3, window_bounds = array<i64: 512, 256>}, {pipeline_mode = #tpu.pipeline_mode<synchronous>, transform_indices = @transform_4, window_bounds = array<i64: 1, 256>}, {pipeline_mode = #tpu.pipeline_mode<synchronous>, transform_indices = @transform_5, window_bounds = array<i64: 256, 128>}, {pipeline_mode = #tpu.pipeline_mode<synchronous>, transform_indices = @transform_6, window_bounds = array<i64: 1, 128>}, {pipeline_mode = #tpu.pipeline_mode<synchronous>, transform_indices = @transform_7, window_bounds = array<i64: 128, 128>}, {pipeline_mode = #tpu.pipeline_mode<synchronous>, transform_indices = @transform_8, window_bounds = array<i64: 1, 128>}, {pipeline_mode = #tpu.pipeline_mode<synchronous>, transform_indices = @transform_9, window_bounds = array<i64: 128, 128>}, {pipeline_mode = #tpu.pipeline_mode<synchronous>, transform_indices = @transform_10, window_bounds = array<i64: 1, 128>}, {transform_indices = @transform_11, window_bounds = array<i64: 16, 128>}]} {
    %c0 = arith.constant 0 : index
    %c0_0 = arith.constant 0 : index
    %0 = vector.load %arg1[%c0, %c0_0] : memref<16x784xbf16, #tpu.memory_space<vmem>>, vector<16x784xbf16>
    %c0_1 = arith.constant 0 : index
    %c0_2 = arith.constant 0 : index
    %1 = vector.load %arg2[%c0_1, %c0_2] : memref<784x512xbf16, #tpu.memory_space<vmem>>, vector<784x512xbf16>
    %cst = arith.constant dense<0.000000e+00> : vector<16x512xf32>
    %2 = tpu.matmul %0, %1, %cst {dimension_numbers = #tpu.dot_dimension_numbers<[1], [0], [0], [1], [0, 0, 1, 1], [], []>} : vector<16x784xbf16>, vector<784x512xbf16>, vector<16x512xf32> -> vector<16x512xf32>
    %c0_3 = arith.constant 0 : index
    %c0_4 = arith.constant 0 : index
    %3 = vector.load %arg3[%c0_3, %c0_4] : memref<1x512xf32, #tpu.memory_space<vmem>>, vector<1x512xf32>
    %4 = vector.broadcast %3 : vector<1x512xf32> to vector<16x512xf32>
    %5 = arith.addf %2, %4 : vector<16x512xf32>
    %cst_5 = arith.constant 0.000000e+00 : f32
    %6 = vector.broadcast %cst_5 : f32 to vector<16x512xf32>
    %7 = arith.maximumf %5, %6 : vector<16x512xf32>
    %8 = arith.truncf %7 : vector<16x512xf32> to vector<16x512xbf16>
    %c0_6 = arith.constant 0 : index
    %c0_7 = arith.constant 0 : index
    %9 = vector.load %arg4[%c0_6, %c0_7] : memref<512x256xbf16, #tpu.memory_space<vmem>>, vector<512x256xbf16>
    %cst_8 = arith.constant dense<0.000000e+00> : vector<16x256xf32>
    %10 = tpu.matmul %8, %9, %cst_8 {dimension_numbers = #tpu.dot_dimension_numbers<[1], [0], [0], [1], [0, 0, 1, 1], [], []>} : vector<16x512xbf16>, vector<512x256xbf16>, vector<16x256xf32> -> vector<16x256xf32>
    %c0_9 = arith.constant 0 : index
    %c0_10 = arith.constant 0 : index
    %11 = vector.load %arg5[%c0_9, %c0_10] : memref<1x256xf32, #tpu.memory_space<vmem>>, vector<1x256xf32>
    %12 = vector.broadcast %11 : vector<1x256xf32> to vector<16x256xf32>
    %13 = arith.addf %10, %12 : vector<16x256xf32>
    %cst_11 = arith.constant 0.000000e+00 : f32
    %14 = vector.broadcast %cst_11 : f32 to vector<16x256xf32>
    %15 = arith.maximumf %13, %14 : vector<16x256xf32>
    %16 = arith.truncf %15 : vector<16x256xf32> to vector<16x256xbf16>
    %c0_12 = arith.constant 0 : index
    %c0_13 = arith.constant 0 : index
    %17 = vector.load %arg6[%c0_12, %c0_13] : memref<256x128xbf16, #tpu.memory_space<vmem>>, vector<256x128xbf16>
    %cst_14 = arith.constant dense<0.000000e+00> : vector<16x128xf32>
    %18 = tpu.matmul %16, %17, %cst_14 {dimension_numbers = #tpu.dot_dimension_numbers<[1], [0], [0], [1], [0, 0, 1, 1], [], []>} : vector<16x256xbf16>, vector<256x128xbf16>, vector<16x128xf32> -> vector<16x128xf32>
    %c0_15 = arith.constant 0 : index
    %c0_16 = arith.constant 0 : index
    %19 = vector.load %arg7[%c0_15, %c0_16] : memref<1x128xf32, #tpu.memory_space<vmem>>, vector<1x128xf32>
    %20 = vector.broadcast %19 : vector<1x128xf32> to vector<16x128xf32>
    %21 = arith.addf %18, %20 : vector<16x128xf32>
    %cst_17 = arith.constant 0.000000e+00 : f32
    %22 = vector.broadcast %cst_17 : f32 to vector<16x128xf32>
    %23 = arith.maximumf %21, %22 : vector<16x128xf32>
    %24 = arith.truncf %23 : vector<16x128xf32> to vector<16x128xbf16>
    %c0_18 = arith.constant 0 : index
    %c0_19 = arith.constant 0 : index
    %25 = vector.load %arg8[%c0_18, %c0_19] : memref<128x128xbf16, #tpu.memory_space<vmem>>, vector<128x128xbf16>
    %cst_20 = arith.constant dense<0.000000e+00> : vector<16x128xf32>
    %26 = tpu.matmul %24, %25, %cst_20 {dimension_numbers = #tpu.dot_dimension_numbers<[1], [0], [0], [1], [0, 0, 1, 1], [], []>} : vector<16x128xbf16>, vector<128x128xbf16>, vector<16x128xf32> -> vector<16x128xf32>
    %c0_21 = arith.constant 0 : index
    %c0_22 = arith.constant 0 : index
    %27 = vector.load %arg9[%c0_21, %c0_22] : memref<1x128xf32, #tpu.memory_space<vmem>>, vector<1x128xf32>
    %28 = vector.broadcast %27 : vector<1x128xf32> to vector<16x128xf32>
    %29 = arith.addf %26, %28 : vector<16x128xf32>
    %cst_23 = arith.constant 0.000000e+00 : f32
    %30 = vector.broadcast %cst_23 : f32 to vector<16x128xf32>
    %31 = arith.maximumf %29, %30 : vector<16x128xf32>
    %32 = arith.truncf %31 : vector<16x128xf32> to vector<16x128xbf16>
    %c0_24 = arith.constant 0 : index
    %c0_25 = arith.constant 0 : index
    %33 = vector.load %arg10[%c0_24, %c0_25] : memref<128x128xbf16, #tpu.memory_space<vmem>>, vector<128x128xbf16>
    %cst_26 = arith.constant dense<0.000000e+00> : vector<16x128xf32>
    %34 = tpu.matmul %32, %33, %cst_26 {dimension_numbers = #tpu.dot_dimension_numbers<[1], [0], [0], [1], [0, 0, 1, 1], [], []>} : vector<16x128xbf16>, vector<128x128xbf16>, vector<16x128xf32> -> vector<16x128xf32>
    %c0_27 = arith.constant 0 : index
    %c0_28 = arith.constant 0 : index
    %35 = vector.load %arg11[%c0_27, %c0_28] : memref<1x128xf32, #tpu.memory_space<vmem>>, vector<1x128xf32>
    %36 = vector.broadcast %35 : vector<1x128xf32> to vector<16x128xf32>
    %37 = arith.addf %34, %36 : vector<16x128xf32>
    %cst_29 = arith.constant 0.000000e+00 : f32
    %38 = vector.broadcast %cst_29 : f32 to vector<16x128xf32>
    %39 = arith.maximumf %37, %38 : vector<16x128xf32>
    %40 = arith.truncf %39 : vector<16x128xf32> to vector<16x128xbf16>
    %c0_30 = arith.constant 0 : index
    %c0_31 = arith.constant 0 : index
    %41 = vector.load %arg12[%c0_30, %c0_31] : memref<16x128xbf16, #tpu.memory_space<vmem>>, vector<16x128xbf16>
    tpu.vector_store %arg12[%c0_30, %c0_31], %40 {strides = array<i32>} : memref<16x128xbf16, #tpu.memory_space<vmem>>, vector<16x128xbf16>,
    return
  }
  func.func @transform_0(%arg0: i32) -> (i32, i32) {
    %c0_i32 = arith.constant 0 : i32
    %c0_i32_0 = arith.constant 0 : i32
    return %arg0, %c0_i32 : i32, i32
  }
  func.func @transform_1(%arg0: i32) -> (i32, i32) {
    %c0_i32 = arith.constant 0 : i32
    %c0_i32_0 = arith.constant 0 : i32
    %c0_i32_1 = arith.constant 0 : i32
    return %c0_i32, %c0_i32_0 : i32, i32
  }
  func.func @transform_2(%arg0: i32) -> (i32, i32) {
    %c0_i32 = arith.constant 0 : i32
    %c0_i32_0 = arith.constant 0 : i32
    %c0_i32_1 = arith.constant 0 : i32
    return %c0_i32, %c0_i32_0 : i32, i32
  }
  func.func @transform_3(%arg0: i32) -> (i32, i32) {
    %c0_i32 = arith.constant 0 : i32
    %c0_i32_0 = arith.constant 0 : i32
    %c0_i32_1 = arith.constant 0 : i32
    return %c0_i32, %c0_i32_0 : i32, i32
  }
  func.func @transform_4(%arg0: i32) -> (i32, i32) {
    %c0_i32 = arith.constant 0 : i32
    %c0_i32_0 = arith.constant 0 : i32
    %c0_i32_1 = arith.constant 0 : i32
    return %c0_i32, %c0_i32_0 : i32, i32
  }
  func.func @transform_5(%arg0: i32) -> (i32, i32) {
    %c0_i32 = arith.constant 0 : i32
    %c0_i32_0 = arith.constant 0 : i32
    %c0_i32_1 = arith.constant 0 : i32
    return %c0_i32, %c0_i32_0 : i32, i32
  }
  func.func @transform_6(%arg0: i32) -> (i32, i32) {
    %c0_i32 = arith.constant 0 : i32
    %c0_i32_0 = arith.constant 0 : i32
    %c0_i32_1 = arith.constant 0 : i32
    return %c0_i32, %c0_i32_0 : i32, i32
  }
  func.func @transform_7(%arg0: i32) -> (i32, i32) {
    %c0_i32 = arith.constant 0 : i32
    %c0_i32_0 = arith.constant 0 : i32
    %c0_i32_1 = arith.constant 0 : i32
    return %c0_i32, %c0_i32_0 : i32, i32
  }
  func.func @transform_8(%arg0: i32) -> (i32, i32) {
    %c0_i32 = arith.constant 0 : i32
    %c0_i32_0 = arith.constant 0 : i32
    %c0_i32_1 = arith.constant 0 : i32
    return %c0_i32, %c0_i32_0 : i32, i32
  }
  func.func @transform_9(%arg0: i32) -> (i32, i32) {
    %c0_i32 = arith.constant 0 : i32
    %c0_i32_0 = arith.constant 0 : i32
    %c0_i32_1 = arith.constant 0 : i32
    return %c0_i32, %c0_i32_0 : i32, i32
  }
  func.func @transform_10(%arg0: i32) -> (i32, i32) {
    %c0_i32 = arith.constant 0 : i32
    %c0_i32_0 = arith.constant 0 : i32
    %c0_i32_1 = arith.constant 0 : i32
    return %c0_i32, %c0_i32_0 : i32, i32
  }
  func.func @transform_11(%arg0: i32) -> (i32, i32) {
    %c0_i32 = arith.constant 0 : i32
    %c0_i32_0 = arith.constant 0 : i32
    return %arg0, %c0_i32 : i32, i32
  }
}

</mosaic_0001>

<bundles_post_ra>
// kernel: mlp_forward.1
= control target key start
LH: loop header
LB: loop body
LE: loop exit
PB: predicated region body
PF: predicated region fallthrough
CT: control target
= control target key end

     0   :  { %v3419_v1 = vmov 0   ;;  %vm1280_vm0 = vcmask 130048   ;;  %vm3421_vm1 = vmmov 0   ;;  %s4450_s1 = inlined_call_operand.vmem [shape: bf16[784,512], index: 1, kind: input, shape index: {}]   ;;  %s4451_s0 = inlined_call_operand.vmem [shape: bf16[16,784], index: 0, kind: input, shape index: {}]   ;;  %s4452_s3 = inlined_call_operand.vmem [shape: bf16[512,256], index: 3, kind: input, shape index: {}]   ;;  %s4453_s5 = inlined_call_operand.vmem [shape: bf16[256,128], index: 5, kind: input, shape index: {}]   ;;  %s4454_s2 = inlined_call_operand.vmem [shape: f32[1,512], index: 2, kind: input, shape index: {}]   ;;  %s4455_s7 = inlined_call_operand.vmem [shape: bf16[128,128], index: 7, kind: input, shape index: {}]   ;;  %s4456_s4 = inlined_call_operand.vmem [shape: f32[1,256], index: 4, kind: input, shape index: {}]   ;;  %s4457_s9 = inlined_call_operand.vmem [shape: bf16[128,128], index: 9, kind: input, shape index: {}]   ;;  %s4458_s6 = inlined_call_operand.vmem [shape: f32[1,128], index: 6, kind: input, shape index: {}]   ;;  %s4459_s8 = inlined_call_operand.vmem [shape: f32[1,128], index: 8, kind: input, shape index: {}]   ;;  %s4460_s10 = inlined_call_operand.vmem [shape: f32[1,128], index: 10, kind: input, shape index: {}]   ;;  %s4461_s11 = inlined_call_operand.vmem [shape: bf16[16,128], index: 11, kind: output, shape index: {}]  }
   0x1   :  { %v2986_v0 = vld [vmem:[%s4450_s1 + $0x4] ss:$16 sps:$4 sm:$0xff]   ;;  %1445 = vmatprep.mubr.bf16.mxu1 %v3419_v1  ;;  %v2990_v3 = vld [vmem:[%s4450_s1] ss:$16 sps:$4 sm:$0xff]   ;;  %v2994_v6 = vld [vmem:[%s4450_s1 + $0x8] ss:$16 sps:$4 sm:$0xff]  }
   0x2   :  { %v2988_v2 = vld [vmem:[%s4450_s1 + $0x604] ss:$16 sps:$4 sm:$0xff]   ;;  %1284 = vmatprep.subr.bf16.mxu0 %v2986_v0  ;;  %v2991_v4 = vld [vmem:[%s4450_s1 + $0x600] ss:$16 sps:$4 sm:$0xff]   ;;  %v2996_v7 = vld [vmem:[%s4450_s1 + $0xc] ss:$16 sps:$4 sm:$0xff]  }
   0x3   :  { %1413 = vmatprep.subr.bf16.mxu1 %v2988_v2  ;;  %v2992_v5 = vld [vmem:[%s4450_s1 + $0x24] ss:$16 sps:$4 sm:$0xff]   ;;  %1285 = vmatpush1.bf16.msra.mxu0 %v2990_v3  ;;  %v2997_v8 = vld [vmem:[%s4450_s1 + $0x20] ss:$16 sps:$4 sm:$0xff]   ;;  %v3001_v11 = vld [vmem:[%s4450_s1 + $0x28] ss:$16 sps:$4 sm:$0xff]  }
   0x4   :  { %1414 = vmatpush1.bf16.msra.mxu1 %v2991_v4  ;;  %1286 = vmatprep.subr.bf16.mxu0 %v2992_v5  ;;  %v2998_v9 = vld [vmem:[%s4451_s0 + $0x18] ss:$28 sps:$4 sm:$0xff]   ;;  %v3003_v12 = vld [vmem:[%s4450_s1 + $0x2c] ss:$16 sps:$4 sm:$0xff]   ;;  %v3004_v13 = vld [vmem:[%s4450_s1 + $0x40] ss:$16 sps:$4 sm:$0xff]  }
   0x5   :  { %1456 = vmatprep.subr.bf16.mxu1 %v2996_v7  ;;  %v2999_v10 = vld [vmem:[%s4450_s1 + $0x44] ss:$16 sps:$4 sm:$0xff]   ;;  %v3009_v15 = vld [vmem:[%s4450_s1 + $0x4c] ss:$16 sps:$4 sm:$0xff]   ;;  %v3010_v16 = vld [vmem:[%s4450_s1 + $0x60] ss:$16 sps:$4 sm:$0xff]  }
   0x6   :  { %v3005_v14 = vld [vmem:[%s4450_s1 + $0x64] ss:$16 sps:$4 sm:$0xff]   ;;  %v3007_v17 = vld [vmem:[%s4450_s1 + $0x48] ss:$16 sps:$4 sm:$0xff]   ;;  %v3015_v19 = vld [vmem:[%s4450_s1 + $0x6c] ss:$16 sps:$4 sm:$0xff]  }
   0x7   :  { %1287 = vmatpush1.bf16.msra.mxu0 %v2997_v8  ;;  %2753 = vmatmul.mubr.msk.bf16.vlgmr.msra.gmra.mrb[0].mxu1 %vm1280_vm0, %v2998_v9  ;;  %v3011_v18 = vld [vmem:[%s4450_s1 + $0x84] ss:$16 sps:$4 sm:$0xff]   ;;  %v3013_v20 = vld [vmem:[%s4450_s1 + $0x68] ss:$16 sps:$4 sm:$0xff]   ;;  %v3016_v21 = vld [vmem:[%s4450_s1 + $0x80] ss:$16 sps:$4 sm:$0xff]  }
   0x8   :  { %1457 = vmatpush1.bf16.msra.mxu1 %v2994_v6  ;;  %1288 = vmatprep.subr.bf16.mxu0 %v2999_v10  ;;  %v3017_v22 = vld [vmem:[%s4450_s1 + $0xa4] ss:$16 sps:$4 sm:$0xff]   ;;  %v3021_v23 = vld [vmem:[%s4450_s1 + $0x8c] ss:$16 sps:$4 sm:$0xff]   ;;  %v3022_v24 = vld [vmem:[%s4450_s1 + $0xa0] ss:$16 sps:$4 sm:$0xff]  }
   0x9   :  { %1458 = vmatprep.subr.bf16.mxu1 %v3003_v12  ;;  %v3019_v25 = vld [vmem:[%s4450_s1 + $0x88] ss:$16 sps:$4 sm:$0xff]   ;;  %v3023_v26 = vld [vmem:[%s4450_s1 + $0xc4] ss:$16 sps:$4 sm:$0xff]   ;;  %v3027_v27 = vld [vmem:[%s4450_s1 + $0xac] ss:$16 sps:$4 sm:$0xff]  }
   0xa   :  { %v3025_v28 = vld [vmem:[%s4450_s1 + $0xa8] ss:$16 sps:$4 sm:$0xff]   ;;  %v3028_v29 = vld [vmem:[%s4450_s1 + $0xc0] ss:$16 sps:$4 sm:$0xff]   ;;  %v3029_v30 = vld [vmem:[%s4450_s1 + $0xe4] ss:$16 sps:$4 sm:$0xff]  }
   0xb   :  { %1289 = vmatpush1.bf16.msra.mxu0 %v3004_v13  ;;  %v3033_v31 = vld [vmem:[%s4450_s1 + $0xcc] ss:$16 sps:$4 sm:$0xff]   ;;  %v3034_v32 = vld [vmem:[%s4450_s1 + $0xe0] ss:$16 sps:$4 sm:$0xff]   ;;  %v3031_v33 = vld [vmem:[%s4450_s1 + $0xc8] ss:$16 sps:$4 sm:$0xff]  }
   0xc   :  { %1459 = vmatpush1.bf16.msra.mxu1 %v3001_v11  ;;  %1290 = vmatprep.subr.bf16.mxu0 %v3005_v14  ;;  %v3035_v34 = vld [vmem:[%s4450_s1 + $0x104] ss:$16 sps:$4 sm:$0xff]   ;;  %v3039_v35 = vld [vmem:[%s4450_s1 + $0xec] ss:$16 sps:$4 sm:$0xff]   ;;  %v3037_v36 = vld [vmem:[%s4450_s1 + $0xe8] ss:$16 sps:$4 sm:$0xff]  }
   0xd   :  { %1460 = vmatprep.subr.bf16.mxu1 %v3009_v15  ;;  %v3040_v37 = vld [vmem:[%s4450_s1 + $0x100] ss:$16 sps:$4 sm:$0xff]   ;;  %v3041_v38 = vld [vmem:[%s4450_s1 + $0x124] ss:$16 sps:$4 sm:$0xff]   ;;  %v3045_v39 = vld [vmem:[%s4450_s1 + $0x10c] ss:$16 sps:$4 sm:$0xff]  }
   0xe   :  { %v3046_v40 = vld [vmem:[%s4450_s1 + $0x120] ss:$16 sps:$4 sm:$0xff]   ;;  %v3043_v41 = vld [vmem:[%s4450_s1 + $0x108] ss:$16 sps:$4 sm:$0xff]   ;;  %v3047_v42 = vld [vmem:[%s4450_s1 + $0x144] ss:$16 sps:$4 sm:$0xff]  }
   0xf   :  { %1291 = vmatpush1.bf16.msra.mxu0 %v3010_v16  ;;  %v3051_v43 = vld [vmem:[%s4450_s1 + $0x12c] ss:$16 sps:$4 sm:$0xff]   ;;  %v3049_v44 = vld [vmem:[%s4450_s1 + $0x128] ss:$16 sps:$4 sm:$0xff]   ;;  %v3052_v45 = vld [vmem:[%s4450_s1 + $0x140] ss:$16 sps:$4 sm:$0xff]  }
  0x10   :  { %1461 = vmatpush1.bf16.msra.mxu1 %v3007_v17  ;;  %1292 = vmatprep.subr.bf16.mxu0 %v3011_v18  ;;  %v3053_v46 = vld [vmem:[%s4450_s1 + $0x164] ss:$16 sps:$4 sm:$0xff]   ;;  %v3057_v47 = vld [vmem:[%s4450_s1 + $0x14c] ss:$16 sps:$4 sm:$0xff]   ;;  %v3055_v48 = vld [vmem:[%s4450_s1 + $0x148] ss:$16 sps:$4 sm:$0xff]  }
  0x11   :  { %1462 = vmatprep.subr.bf16.mxu1 %v3015_v19  ;;  %v3058_v49 = vld [vmem:[%s4450_s1 + $0x160] ss:$16 sps:$4 sm:$0xff]   ;;  %v3059_v51 = vld [vmem:[%s4450_s1 + $0x184] ss:$16 sps:$4 sm:$0xff]   ;;  %v3063_v52 = vld [vmem:[%s4450_s1 + $0x16c] ss:$16 sps:$4 sm:$0xff]  }
  0x12   :  { %v3085_v50 = vld [vmem:[%s4451_s0 + $0x4] ss:$28 sps:$4 sm:$0xff]   ;;  %v3061_v53 = vld [vmem:[%s4450_s1 + $0x168] ss:$16 sps:$4 sm:$0xff]   ;;  %v3069_v56 = vld [vmem:[%s4450_s1 + $0x18c] ss:$16 sps:$4 sm:$0xff]  }
  0x13   :  { %1293 = vmatpush1.bf16.msra.mxu0 %v3016_v21  ;;  %1316 = vmatprep.mubr.bf16.mxu0 %v3085_v50  ;;  %v3064_v54 = vld [vmem:[%s4450_s1 + $0x180] ss:$16 sps:$4 sm:$0xff]   ;;  %v3065_v55 = vld [vmem:[%s4450_s1 + $0x1a4] ss:$16 sps:$4 sm:$0xff]   ;;  %v3067_v57 = vld [vmem:[%s4450_s1 + $0x188] ss:$16 sps:$4 sm:$0xff]  }
  0x14   :  { %1463 = vmatpush1.bf16.msra.mxu1 %v3013_v20  ;;  %1294 = vmatprep.subr.bf16.mxu0 %v3017_v22  ;;  %v3070_v58 = vld [vmem:[%s4450_s1 + $0x1a0] ss:$16 sps:$4 sm:$0xff]   ;;  %v3071_v59 = vld [vmem:[%s4450_s1 + $0x1c4] ss:$16 sps:$4 sm:$0xff]   ;;  %v3075_v60 = vld [vmem:[%s4450_s1 + $0x1ac] ss:$16 sps:$4 sm:$0xff]  }
  0x15   :  { %1464 = vmatprep.subr.bf16.mxu1 %v3021_v23  ;;  %1488 = vmatprep.mubr.bf16.mxu1 %v3085_v50  ;;  %v3073_v61 = vld [vmem:[%s4450_s1 + $0x1a8] ss:$16 sps:$4 sm:$0xff]   ;;  %v3076_v62 = vld [vmem:[%s4450_s1 + $0x1c0] ss:$16 sps:$4 sm:$0xff]   ;;  %v3077_v63 = vld [vmem:[%s4450_s1 + $0x1e4] ss:$16 sps:$4 sm:$0xff]  }
  0x16   :  { %v3081_v0 = vld [vmem:[%s4450_s1 + $0x1cc] ss:$16 sps:$4 sm:$0xff]   ;;  %v3079_v2 = vld [vmem:[%s4450_s1 + $0x1c8] ss:$16 sps:$4 sm:$0xff]   ;;  %v3082_v3 = vld [vmem:[%s4450_s1 + $0x1e0] ss:$16 sps:$4 sm:$0xff]  }
  0x17   :  { %1295 = vmatpush1.bf16.msra.mxu0 %v3022_v24  ;;  %v3088_v4 = vld [vmem:[%s4450_s1 + $0x204] ss:$16 sps:$4 sm:$0xff]   ;;  %v3091_v5 = vld [vmem:[%s4450_s1 + $0x1ec] ss:$16 sps:$4 sm:$0xff]   ;;  %v3086_v7 = vld [vmem:[%s4450_s1 + $0x200] ss:$16 sps:$4 sm:$0xff]  }
  0x18   :  { %1465 = vmatpush1.bf16.msra.mxu1 %v3019_v25  ;;  %1296 = vmatprep.subr.bf16.mxu0 %v3023_v26  ;;  %v3083_v6 = vld [vmem:[%s4451_s0] ss:$28 sps:$4 sm:$0xff]   ;;  %v3089_v8 = vld [vmem:[%s4450_s1 + $0x1e8] ss:$16 sps:$4 sm:$0xff]   ;;  %v3094_v9 = vld [vmem:[%s4450_s1 + $0x224] ss:$16 sps:$4 sm:$0xff]  }
  0x19   :  { %1466 = vmatprep.subr.bf16.mxu1 %v3027_v27  ;;  %v3097_v10 = vld [vmem:[%s4450_s1 + $0x20c] ss:$16 sps:$4 sm:$0xff]   ;;  %v3092_v11 = vld [vmem:[%s4450_s1 + $0x220] ss:$16 sps:$4 sm:$0xff]   ;;  %v3095_v12 = vld [vmem:[%s4450_s1 + $0x208] ss:$16 sps:$4 sm:$0xff]  }
  0x1a   :  { %v3100_v13 = vld [vmem:[%s4450_s1 + $0x244] ss:$16 sps:$4 sm:$0xff]   ;;  %v3103_v14 = vld [vmem:[%s4450_s1 + $0x22c] ss:$16 sps:$4 sm:$0xff]   ;;  %v3098_v15 = vld [vmem:[%s4450_s1 + $0x240] ss:$16 sps:$4 sm:$0xff]  }
  0x1b   :  { %1297 = vmatpush1.bf16.msra.mxu0 %v3028_v29  ;;  %v3101_v16 = vld [vmem:[%s4450_s1 + $0x228] ss:$16 sps:$4 sm:$0xff]   ;;  %v3106_v17 = vld [vmem:[%s4450_s1 + $0x264] ss:$16 sps:$4 sm:$0xff]   ;;  %v3109_v18 = vld [vmem:[%s4450_s1 + $0x24c] ss:$16 sps:$4 sm:$0xff]  }
  0x1c   :  { %1467 = vmatpush1.bf16.msra.mxu1 %v3025_v28  ;;  %1298 = vmatprep.subr.bf16.mxu0 %v3029_v30  ;;  %v3104_v19 = vld [vmem:[%s4450_s1 + $0x260] ss:$16 sps:$4 sm:$0xff]   ;;  %v3107_v20 = vld [vmem:[%s4450_s1 + $0x248] ss:$16 sps:$4 sm:$0xff]   ;;  %v3112_v21 = vld [vmem:[%s4450_s1 + $0x284] ss:$16 sps:$4 sm:$0xff]  }
  0x1d   :  { %1468 = vmatprep.subr.bf16.mxu1 %v3033_v31  ;;  %v3115_v22 = vld [vmem:[%s4450_s1 + $0x26c] ss:$16 sps:$4 sm:$0xff]   ;;  %v3110_v23 = vld [vmem:[%s4450_s1 + $0x280] ss:$16 sps:$4 sm:$0xff]   ;;  %v3113_v24 = vld [vmem:[%s4450_s1 + $0x268] ss:$16 sps:$4 sm:$0xff]  }
  0x1e   :  { %v3118_v25 = vld [vmem:[%s4450_s1 + $0x2a4] ss:$16 sps:$4 sm:$0xff]   ;;  %v3121_v26 = vld [vmem:[%s4450_s1 + $0x28c] ss:$16 sps:$4 sm:$0xff]   ;;  %v3116_v27 = vld [vmem:[%s4450_s1 + $0x2a0] ss:$16 sps:$4 sm:$0xff]  }
  0x1f   :  { %1299 = vmatpush1.bf16.msra.mxu0 %v3034_v32  ;;  %v3119_v28 = vld [vmem:[%s4450_s1 + $0x288] ss:$16 sps:$4 sm:$0xff]   ;;  %v3124_v29 = vld [vmem:[%s4450_s1 + $0x2c4] ss:$16 sps:$4 sm:$0xff]   ;;  %v3127_v30 = vld [vmem:[%s4450_s1 + $0x2ac] ss:$16 sps:$4 sm:$0xff]  }
  0x20   :  { %1469 = vmatpush1.bf16.msra.mxu1 %v3031_v33  ;;  %1300 = vmatprep.subr.bf16.mxu0 %v3035_v34  ;;  %v3122_v31 = vld [vmem:[%s4450_s1 + $0x2c0] ss:$16 sps:$4 sm:$0xff]   ;;  %v3125_v32 = vld [vmem:[%s4450_s1 + $0x2a8] ss:$16 sps:$4 sm:$0xff]   ;;  %v3130_v34 = vld [vmem:[%s4450_s1 + $0x2e4] ss:$16 sps:$4 sm:$0xff]  }
  0x21   :  { %1470 = vmatprep.subr.bf16.mxu1 %v3039_v35  ;;  %v3184_v33 = vld [vmem:[%s4451_s0 + $0xc] ss:$28 sps:$4 sm:$0xff]   ;;  %v3154_v50 = vld [vmem:[%s4450_s1 + $0x364] ss:$16 sps:$4 sm:$0xff]  }
  0x22   :  { %v3133_v35 = vld [vmem:[%s4450_s1 + $0x2cc] ss:$16 sps:$4 sm:$0xff]  }
  0x23   :  { %1301 = vmatpush1.bf16.msra.mxu0 %v3040_v37  ;;  %v3131_v37 = vld [vmem:[%s4450_s1 + $0x2c8] ss:$16 sps:$4 sm:$0xff]  }
  0x24   :  { %1471 = vmatpush1.bf16.msra.mxu1 %v3037_v36  ;;  %1302 = vmatprep.subr.bf16.mxu0 %v3041_v38  ;;  %v3128_v36 = vld [vmem:[%s4450_s1 + $0x2e0] ss:$16 sps:$4 sm:$0xff]   ;;  %v3136_v38 = vld [vmem:[%s4450_s1 + $0x304] ss:$16 sps:$4 sm:$0xff]  }
  0x25   :  { %1472 = vmatprep.subr.bf16.mxu1 %v3045_v39  ;;  %v3139_v39 = vld [vmem:[%s4450_s1 + $0x2ec] ss:$16 sps:$4 sm:$0xff]  }
  0x27   :  { %1303 = vmatpush1.bf16.msra.mxu0 %v3046_v40  ;;  %v3134_v40 = vld [vmem:[%s4450_s1 + $0x300] ss:$16 sps:$4 sm:$0xff]  }
  0x28   :  { %1473 = vmatpush1.bf16.msra.mxu1 %v3043_v41  ;;  %1304 = vmatprep.subr.bf16.mxu0 %v3047_v42  ;;  %v3137_v41 = vld [vmem:[%s4450_s1 + $0x2e8] ss:$16 sps:$4 sm:$0xff]   ;;  %v3142_v42 = vld [vmem:[%s4450_s1 + $0x324] ss:$16 sps:$4 sm:$0xff]  }
  0x29   :  { %1474 = vmatprep.subr.bf16.mxu1 %v3051_v43  ;;  %v3145_v43 = vld [vmem:[%s4450_s1 + $0x30c] ss:$16 sps:$4 sm:$0xff]  }
  0x2b   :  { %1305 = vmatpush1.bf16.msra.mxu0 %v3052_v45  ;;  %v3143_v45 = vld [vmem:[%s4450_s1 + $0x308] ss:$16 sps:$4 sm:$0xff]  }
  0x2c   :  { %1475 = vmatpush1.bf16.msra.mxu1 %v3049_v44  ;;  %1306 = vmatprep.subr.bf16.mxu0 %v3053_v46  ;;  %v3140_v44 = vld [vmem:[%s4450_s1 + $0x320] ss:$16 sps:$4 sm:$0xff]   ;;  %v3148_v46 = vld [vmem:[%s4450_s1 + $0x344] ss:$16 sps:$4 sm:$0xff]  }
  0x2d   :  { %1476 = vmatprep.subr.bf16.mxu1 %v3057_v47  ;;  %v3151_v47 = vld [vmem:[%s4450_s1 + $0x32c] ss:$16 sps:$4 sm:$0xff]  }
  0x2f   :  { %1307 = vmatpush1.bf16.msra.mxu0 %v3058_v49  ;;  %v3149_v49 = vld [vmem:[%s4450_s1 + $0x328] ss:$16 sps:$4 sm:$0xff]  }
  0x30   :  { %1477 = vmatpush1.bf16.msra.mxu1 %v3055_v48  ;;  %1308 = vmatprep.subr.bf16.mxu0 %v3059_v51  ;;  %v3146_v48 = vld [vmem:[%s4450_s1 + $0x340] ss:$16 sps:$4 sm:$0xff]   ;;  %v3157_v51 = vld [vmem:[%s4450_s1 + $0x34c] ss:$16 sps:$4 sm:$0xff]  }
  0x31   :  { %1478 = vmatprep.subr.bf16.mxu1 %v3063_v52  ;;  %v3152_v52 = vld [vmem:[%s4450_s1 + $0x360] ss:$16 sps:$4 sm:$0xff]  }
  0x33   :  { %1309 = vmatpush1.bf16.msra.mxu0 %v3064_v54  ;;  %v3160_v54 = vld [vmem:[%s4450_s1 + $0x384] ss:$16 sps:$4 sm:$0xff]  }
  0x34   :  { %1479 = vmatpush1.bf16.msra.mxu1 %v3061_v53  ;;  %1310 = vmatprep.subr.bf16.mxu0 %v3065_v55  ;;  %v3155_v53 = vld [vmem:[%s4450_s1 + $0x348] ss:$16 sps:$4 sm:$0xff]   ;;  %v3163_v55 = vld [vmem:[%s4450_s1 + $0x36c] ss:$16 sps:$4 sm:$0xff]  }
  0x35   :  { %1480 = vmatprep.subr.bf16.mxu1 %v3069_v56  ;;  %v3158_v56 = vld [vmem:[%s4450_s1 + $0x380] ss:$16 sps:$4 sm:$0xff]  }
  0x37   :  { %1311 = vmatpush1.bf16.msra.mxu0 %v3070_v58  ;;  %v3166_v58 = vld [vmem:[%s4450_s1 + $0x3a4] ss:$16 sps:$4 sm:$0xff]  }
  0x38   :  { %1481 = vmatpush1.bf16.msra.mxu1 %v3067_v57  ;;  %1312 = vmatprep.subr.bf16.mxu0 %v3071_v59  ;;  %v3161_v57 = vld [vmem:[%s4450_s1 + $0x368] ss:$16 sps:$4 sm:$0xff]   ;;  %v3169_v59 = vld [vmem:[%s4450_s1 + $0x38c] ss:$16 sps:$4 sm:$0xff]  }
  0x39   :  { %1482 = vmatprep.subr.bf16.mxu1 %v3075_v60  ;;  %v3164_v60 = vld [vmem:[%s4450_s1 + $0x3a0] ss:$16 sps:$4 sm:$0xff]  }
  0x3b   :  { %1313 = vmatpush1.bf16.msra.mxu0 %v3076_v62  ;;  %v3172_v62 = vld [vmem:[%s4450_s1 + $0x3c4] ss:$16 sps:$4 sm:$0xff]  }
  0x3c   :  { %1483 = vmatpush1.bf16.msra.mxu1 %v3073_v61  ;;  %1314 = vmatprep.subr.bf16.mxu0 %v3077_v63  ;;  %v3167_v61 = vld [vmem:[%s4450_s1 + $0x388] ss:$16 sps:$4 sm:$0xff]   ;;  %v3175_v63 = vld [vmem:[%s4450_s1 + $0x3ac] ss:$16 sps:$4 sm:$0xff]  }
  0x3d   :  { %1484 = vmatprep.subr.bf16.mxu1 %v3081_v0  ;;  %v3170_v0 = vld [vmem:[%s4450_s1 + $0x3c0] ss:$16 sps:$4 sm:$0xff]  }
  0x3f   :  { %1315 = vmatpush1.bf16.msra.mxu0 %v3082_v3  ;;  %v3178_v3 = vld [vmem:[%s4450_s1 + $0x3e4] ss:$16 sps:$4 sm:$0xff]  }
  0x40   :  { %1485 = vmatpush1.bf16.msra.mxu1 %v3079_v2  ;;  %1327 = vmatprep.subr.bf16.mxu0 %v3088_v4  ;;  %v3173_v2 = vld [vmem:[%s4450_s1 + $0x3a8] ss:$16 sps:$4 sm:$0xff]   ;;  %v3181_v4 = vld [vmem:[%s4450_s1 + $0x3cc] ss:$16 sps:$4 sm:$0xff]  }
  0x41   :  { %1486 = vmatprep.subr.bf16.mxu1 %v3091_v5  ;;  %v3176_v5 = vld [vmem:[%s4450_s1 + $0x3e0] ss:$16 sps:$4 sm:$0xff]  }
  0x42   :  { %1317 = vmatmul.mubr.bf16.vlgmr.msra.gmra.mrb[0].mxu0 %v3083_v6 }
  0x43   :  { %1328 = vmatpush1.bf16.msra.mxu0 %v3086_v7  ;;  %1359 = vmatprep.mubr.bf16.mxu0 %v3184_v33  ;;  %v3187_v7 = vld [vmem:[%s4450_s1 + $0x404] ss:$16 sps:$4 sm:$0xff]  }
  0x44   :  { %1487 = vmatpush1.bf16.msra.mxu1 %v3089_v8  ;;  %1329 = vmatprep.subr.bf16.mxu0 %v3094_v9  ;;  %v3190_v8 = vld [vmem:[%s4450_s1 + $0x3ec] ss:$16 sps:$4 sm:$0xff]   ;;  %v3182_v9 = vld [vmem:[%s4451_s0 + $0x8] ss:$28 sps:$4 sm:$0xff]  }
  0x45   :  { %1499 = vmatprep.subr.bf16.mxu1 %v3097_v10  ;;  %v3185_v10 = vld [vmem:[%s4450_s1 + $0x400] ss:$16 sps:$4 sm:$0xff]  }
  0x47   :  { %1330 = vmatpush1.bf16.msra.mxu0 %v3092_v11  ;;  %1489 = vmatmul.mubr.bf16.vlgmr.msra.gmra.mrb[4].mxu1 %v3083_v6  ;;  %v3179_v6 = vld [vmem:[%s4450_s1 + $0x3c8] ss:$16 sps:$4 sm:$0xff]  }
  0x48   :  { %1500 = vmatpush1.bf16.msra.mxu1 %v3095_v12  ;;  %1331 = vmatprep.subr.bf16.mxu0 %v3100_v13  ;;  %v3188_v11 = vld [vmem:[%s4450_s1 + $0x3e8] ss:$16 sps:$4 sm:$0xff]   ;;  %v3193_v12 = vld [vmem:[%s4450_s1 + $0x424] ss:$16 sps:$4 sm:$0xff]   ;;  %v3196_v13 = vld [vmem:[%s4450_s1 + $0x40c] ss:$16 sps:$4 sm:$0xff]  }
  0x49   :  { %1501 = vmatprep.subr.bf16.mxu1 %v3103_v14  ;;  %1531 = vmatprep.mubr.bf16.mxu1 %v3184_v33  ;;  %v3191_v14 = vld [vmem:[%s4450_s1 + $0x420] ss:$16 sps:$4 sm:$0xff]   ;;  %v3223_v33 = vld [vmem:[%s4450_s1 + $0x4c4] ss:$16 sps:$4 sm:$0xff]  }
  0x4b   :  { %1332 = vmatpush1.bf16.msra.mxu0 %v3098_v15  ;;  %v3194_v15 = vld [vmem:[%s4450_s1 + $0x408] ss:$16 sps:$4 sm:$0xff]  }
  0x4c   :  { %1502 = vmatpush1.bf16.msra.mxu1 %v3101_v16  ;;  %1333 = vmatprep.subr.bf16.mxu0 %v3106_v17  ;;  %v3283_v16 = vld [vmem:[%s4451_s0 + $0x14] ss:$28 sps:$4 sm:$0xff]  }
  0x4d   :  { %1503 = vmatprep.subr.bf16.mxu1 %v3109_v18  ;;  %v3199_v17 = vld [vmem:[%s4450_s1 + $0x444] ss:$16 sps:$4 sm:$0xff]   ;;  %v3202_v18 = vld [vmem:[%s4450_s1 + $0x42c] ss:$16 sps:$4 sm:$0xff]  }
  0x4f   :  { %1334 = vmatpush1.bf16.msra.mxu0 %v3104_v19  ;;  %v3197_v19 = vld [vmem:[%s4450_s1 + $0x440] ss:$16 sps:$4 sm:$0xff]  }
  0x50   :  { %1504 = vmatpush1.bf16.msra.mxu1 %v3107_v20  ;;  %1335 = vmatprep.subr.bf16.mxu0 %v3112_v21  ;;  %v3200_v20 = vld [vmem:[%s4450_s1 + $0x428] ss:$16 sps:$4 sm:$0xff]   ;;  %v3205_v21 = vld [vmem:[%s4450_s1 + $0x464] ss:$16 sps:$4 sm:$0xff]  }
  0x51   :  { %1505 = vmatprep.subr.bf16.mxu1 %v3115_v22  ;;  %v3208_v22 = vld [vmem:[%s4450_s1 + $0x44c] ss:$16 sps:$4 sm:$0xff]  }
  0x53   :  { %1336 = vmatpush1.bf16.msra.mxu0 %v3110_v23  ;;  %v3203_v23 = vld [vmem:[%s4450_s1 + $0x460] ss:$16 sps:$4 sm:$0xff]  }
  0x54   :  { %1506 = vmatpush1.bf16.msra.mxu1 %v3113_v24  ;;  %1337 = vmatprep.subr.bf16.mxu0 %v3118_v25  ;;  %v3206_v24 = vld [vmem:[%s4450_s1 + $0x448] ss:$16 sps:$4 sm:$0xff]   ;;  %v3211_v25 = vld [vmem:[%s4450_s1 + $0x484] ss:$16 sps:$4 sm:$0xff]  }
  0x55   :  { %1507 = vmatprep.subr.bf16.mxu1 %v3121_v26  ;;  %v3214_v26 = vld [vmem:[%s4450_s1 + $0x46c] ss:$16 sps:$4 sm:$0xff]  }
  0x57   :  { %1338 = vmatpush1.bf16.msra.mxu0 %v3116_v27  ;;  %v3209_v27 = vld [vmem:[%s4450_s1 + $0x480] ss:$16 sps:$4 sm:$0xff]  }
  0x58   :  { %1508 = vmatpush1.bf16.msra.mxu1 %v3119_v28  ;;  %1339 = vmatprep.subr.bf16.mxu0 %v3124_v29  ;;  %v3212_v28 = vld [vmem:[%s4450_s1 + $0x468] ss:$16 sps:$4 sm:$0xff]   ;;  %v3217_v29 = vld [vmem:[%s4450_s1 + $0x4a4] ss:$16 sps:$4 sm:$0xff]  }
  0x59   :  { %1509 = vmatprep.subr.bf16.mxu1 %v3127_v30  ;;  %v3220_v30 = vld [vmem:[%s4450_s1 + $0x48c] ss:$16 sps:$4 sm:$0xff]  }
  0x5b   :  { %1340 = vmatpush1.bf16.msra.mxu0 %v3122_v31  ;;  %v3215_v31 = vld [vmem:[%s4450_s1 + $0x4a0] ss:$16 sps:$4 sm:$0xff]  }
  0x5c   :  { %1510 = vmatpush1.bf16.msra.mxu1 %v3125_v32  ;;  %1341 = vmatprep.subr.bf16.mxu0 %v3130_v34  ;;  %v3218_v32 = vld [vmem:[%s4450_s1 + $0x488] ss:$16 sps:$4 sm:$0xff]   ;;  %v3226_v34 = vld [vmem:[%s4450_s1 + $0x4ac] ss:$16 sps:$4 sm:$0xff]  }
  0x5d   :  { %1511 = vmatprep.subr.bf16.mxu1 %v3133_v35  ;;  %v3221_v35 = vld [vmem:[%s4450_s1 + $0x4c0] ss:$16 sps:$4 sm:$0xff]  }
  0x5f   :  { %1342 = vmatpush1.bf16.msra.mxu0 %v3128_v36  ;;  %v3224_v36 = vld [vmem:[%s4450_s1 + $0x4a8] ss:$16 sps:$4 sm:$0xff]  }
  0x60   :  { %1512 = vmatpush1.bf16.msra.mxu1 %v3131_v37  ;;  %1343 = vmatprep.subr.bf16.mxu0 %v3136_v38  ;;  %v3229_v37 = vld [vmem:[%s4450_s1 + $0x4e4] ss:$16 sps:$4 sm:$0xff]   ;;  %v3232_v38 = vld [vmem:[%s4450_s1 + $0x4cc] ss:$16 sps:$4 sm:$0xff]  }
  0x61   :  { %1513 = vmatprep.subr.bf16.mxu1 %v3139_v39  ;;  %v3227_v39 = vld [vmem:[%s4450_s1 + $0x4e0] ss:$16 sps:$4 sm:$0xff]  }
  0x63   :  { %1344 = vmatpush1.bf16.msra.mxu0 %v3134_v40  ;;  %v3230_v40 = vld [vmem:[%s4450_s1 + $0x4c8] ss:$16 sps:$4 sm:$0xff]  }
  0x64   :  { %1514 = vmatpush1.bf16.msra.mxu1 %v3137_v41  ;;  %1345 = vmatprep.subr.bf16.mxu0 %v3142_v42  ;;  %v3235_v41 = vld [vmem:[%s4450_s1 + $0x504] ss:$16 sps:$4 sm:$0xff]   ;;  %v3238_v42 = vld [vmem:[%s4450_s1 + $0x4ec] ss:$16 sps:$4 sm:$0xff]  }
  0x65   :  { %1515 = vmatprep.subr.bf16.mxu1 %v3145_v43  ;;  %v3233_v43 = vld [vmem:[%s4450_s1 + $0x500] ss:$16 sps:$4 sm:$0xff]  }
  0x67   :  { %1346 = vmatpush1.bf16.msra.mxu0 %v3140_v44  ;;  %v3236_v44 = vld [vmem:[%s4450_s1 + $0x4e8] ss:$16 sps:$4 sm:$0xff]  }
  0x68   :  { %1516 = vmatpush1.bf16.msra.mxu1 %v3143_v45  ;;  %1347 = vmatprep.subr.bf16.mxu0 %v3148_v46  ;;  %v3241_v45 = vld [vmem:[%s4450_s1 + $0x524] ss:$16 sps:$4 sm:$0xff]   ;;  %v3244_v46 = vld [vmem:[%s4450_s1 + $0x50c] ss:$16 sps:$4 sm:$0xff]  }
  0x69   :  { %1517 = vmatprep.subr.bf16.mxu1 %v3151_v47  ;;  %v3239_v47 = vld [vmem:[%s4450_s1 + $0x520] ss:$16 sps:$4 sm:$0xff]  }
  0x6b   :  { %1348 = vmatpush1.bf16.msra.mxu0 %v3146_v48  ;;  %v3242_v48 = vld [vmem:[%s4450_s1 + $0x508] ss:$16 sps:$4 sm:$0xff]  }
  0x6c   :  { %1518 = vmatpush1.bf16.msra.mxu1 %v3149_v49  ;;  %1349 = vmatprep.subr.bf16.mxu0 %v3154_v50  ;;  %v3247_v49 = vld [vmem:[%s4450_s1 + $0x544] ss:$16 sps:$4 sm:$0xff]   ;;  %v3250_v50 = vld [vmem:[%s4450_s1 + $0x52c] ss:$16 sps:$4 sm:$0xff]  }
  0x6d   :  { %1519 = vmatprep.subr.bf16.mxu1 %v3157_v51  ;;  %v3245_v51 = vld [vmem:[%s4450_s1 + $0x540] ss:$16 sps:$4 sm:$0xff]  }
  0x6f   :  { %1350 = vmatpush1.bf16.msra.mxu0 %v3152_v52  ;;  %v3248_v52 = vld [vmem:[%s4450_s1 + $0x528] ss:$16 sps:$4 sm:$0xff]  }
  0x70   :  { %1520 = vmatpush1.bf16.msra.mxu1 %v3155_v53  ;;  %1351 = vmatprep.subr.bf16.mxu0 %v3160_v54  ;;  %v3253_v53 = vld [vmem:[%s4450_s1 + $0x564] ss:$16 sps:$4 sm:$0xff]   ;;  %v3256_v54 = vld [vmem:[%s4450_s1 + $0x54c] ss:$16 sps:$4 sm:$0xff]  }
  0x71   :  { %1521 = vmatprep.subr.bf16.mxu1 %v3163_v55  ;;  %v3251_v55 = vld [vmem:[%s4450_s1 + $0x560] ss:$16 sps:$4 sm:$0xff]  }
  0x73   :  { %1352 = vmatpush1.bf16.msra.mxu0 %v3158_v56  ;;  %v3254_v56 = vld [vmem:[%s4450_s1 + $0x548] ss:$16 sps:$4 sm:$0xff]  }
  0x74   :  { %1522 = vmatpush1.bf16.msra.mxu1 %v3161_v57  ;;  %1353 = vmatprep.subr.bf16.mxu0 %v3166_v58  ;;  %v3259_v57 = vld [vmem:[%s4450_s1 + $0x584] ss:$16 sps:$4 sm:$0xff]   ;;  %v3262_v58 = vld [vmem:[%s4450_s1 + $0x56c] ss:$16 sps:$4 sm:$0xff]  }
  0x75   :  { %1523 = vmatprep.subr.bf16.mxu1 %v3169_v59  ;;  %v3257_v59 = vld [vmem:[%s4450_s1 + $0x580] ss:$16 sps:$4 sm:$0xff]  }
  0x77   :  { %1354 = vmatpush1.bf16.msra.mxu0 %v3164_v60  ;;  %v3260_v60 = vld [vmem:[%s4450_s1 + $0x568] ss:$16 sps:$4 sm:$0xff]  }
  0x78   :  { %1524 = vmatpush1.bf16.msra.mxu1 %v3167_v61  ;;  %1355 = vmatprep.subr.bf16.mxu0 %v3172_v62  ;;  %v3265_v61 = vld [vmem:[%s4450_s1 + $0x5a4] ss:$16 sps:$4 sm:$0xff]   ;;  %v3268_v62 = vld [vmem:[%s4450_s1 + $0x58c] ss:$16 sps:$4 sm:$0xff]  }
  0x79   :  { %1525 = vmatprep.subr.bf16.mxu1 %v3175_v63  ;;  %v3263_v63 = vld [vmem:[%s4450_s1 + $0x5a0] ss:$16 sps:$4 sm:$0xff]  }
  0x7b   :  { %1356 = vmatpush1.bf16.msra.mxu0 %v3170_v0  ;;  %v3266_v0 = vld [vmem:[%s4450_s1 + $0x588] ss:$16 sps:$4 sm:$0xff]  }
  0x7c   :  { %1526 = vmatpush1.bf16.msra.mxu1 %v3173_v2  ;;  %1357 = vmatprep.subr.bf16.mxu0 %v3178_v3  ;;  %v3271_v2 = vld [vmem:[%s4450_s1 + $0x5c4] ss:$16 sps:$4 sm:$0xff]   ;;  %v3274_v3 = vld [vmem:[%s4450_s1 + $0x5ac] ss:$16 sps:$4 sm:$0xff]  }
  0x7d   :  { %1527 = vmatprep.subr.bf16.mxu1 %v3181_v4  ;;  %v3269_v4 = vld [vmem:[%s4450_s1 + $0x5c0] ss:$16 sps:$4 sm:$0xff]  }
  0x7f   :  { %1358 = vmatpush1.bf16.msra.mxu0 %v3176_v5  ;;  %v3272_v5 = vld [vmem:[%s4450_s1 + $0x5a8] ss:$16 sps:$4 sm:$0xff]  }
  0x80   :  { %1528 = vmatpush1.bf16.msra.mxu1 %v3179_v6  ;;  %1370 = vmatprep.subr.bf16.mxu0 %v3187_v7  ;;  %v3277_v6 = vld [vmem:[%s4450_s1 + $0x5e4] ss:$16 sps:$4 sm:$0xff]   ;;  %v3280_v7 = vld [vmem:[%s4450_s1 + $0x5cc] ss:$16 sps:$4 sm:$0xff]  }
  0x81   :  { %1529 = vmatprep.subr.bf16.mxu1 %v3190_v8  ;;  %v3275_v8 = vld [vmem:[%s4450_s1 + $0x5e0] ss:$16 sps:$4 sm:$0xff]  }
  0x82   :  { %1360 = vmatmul.mubr.bf16.vlgmr.msra.gmra.mrb[0].mxu0 %v3182_v9 }
  0x83   :  { %1371 = vmatpush1.bf16.msra.mxu0 %v3185_v10  ;;  %1402 = vmatprep.mubr.bf16.mxu0 %v3283_v16  ;;  %v3292_v10 = vld [vmem:[%s4452_s3 + $0x4] ss:$8 sps:$4 sm:$0xff]  }
  0x84   :  { %1530 = vmatpush1.bf16.msra.mxu1 %v3188_v11  ;;  %1372 = vmatprep.subr.bf16.mxu0 %v3193_v12  ;;  %v3286_v11 = vld [vmem:[%s4450_s1 + $0x5ec] ss:$16 sps:$4 sm:$0xff]  }
  0x85   :  { %1542 = vmatprep.subr.bf16.mxu1 %v3196_v13  ;;  %v3281_v12 = vld [vmem:[%s4451_s0 + $0x10] ss:$28 sps:$4 sm:$0xff]   ;;  %v3290_v13 = vld [vmem:[%s4452_s3] ss:$8 sps:$4 sm:$0xff]  }
  0x87   :  { %1373 = vmatpush1.bf16.msra.mxu0 %v3191_v14  ;;  %1532 = vmatmul.mubr.bf16.vlgmr.msra.gmra.mrb[4].mxu1 %v3182_v9  ;;  %v3278_v9 = vld [vmem:[%s4450_s1 + $0x5c8] ss:$16 sps:$4 sm:$0xff]  }
  0x88   :  { %1543 = vmatpush1.bf16.msra.mxu1 %v3194_v15  ;;  %1374 = vmatprep.subr.bf16.mxu0 %v3199_v17  ;;  %v3284_v14 = vld [vmem:[%s4450_s1 + $0x5e8] ss:$16 sps:$4 sm:$0xff]   ;;  %v3295_v15 = vld [vmem:[%s4452_s3 + $0x14] ss:$8 sps:$4 sm:$0xff]  }
  0x89   :  { %1544 = vmatprep.subr.bf16.mxu1 %v3202_v18  ;;  %1574 = vmatprep.mubr.bf16.mxu1 %v3283_v16  ;;  %v3289_v16 = vld [vmem:[%s4450_s1 + $0x60c] ss:$16 sps:$4 sm:$0xff]   ;;  %v3293_v17 = vld [vmem:[%s4452_s3 + $0x10] ss:$8 sps:$4 sm:$0xff]  }
  0x8a   :  { %v3287_v18 = vld [vmem:[%s4450_s1 + $0x608] ss:$16 sps:$4 sm:$0xff]  }
  0x8b   :  { %1375 = vmatpush1.bf16.msra.mxu0 %v3197_v19  ;;  %v3298_v19 = vld [vmem:[%s4452_s3 + $0x24] ss:$8 sps:$4 sm:$0xff]  }
  0x8c   :  { %1545 = vmatpush1.bf16.msra.mxu1 %v3200_v20  ;;  %1376 = vmatprep.subr.bf16.mxu0 %v3205_v21  ;;  %v3296_v20 = vld [vmem:[%s4452_s3 + $0x20] ss:$8 sps:$4 sm:$0xff]   ;;  %v3301_v21 = vld [vmem:[%s4452_s3 + $0x34] ss:$8 sps:$4 sm:$0xff]  }
  0x8d   :  { %1546 = vmatprep.subr.bf16.mxu1 %v3208_v22  ;;  %v3299_v22 = vld [vmem:[%s4452_s3 + $0x30] ss:$8 sps:$4 sm:$0xff]  }
  0x8f   :  { %1377 = vmatpush1.bf16.msra.mxu0 %v3203_v23  ;;  %v3304_v23 = vld [vmem:[%s4452_s3 + $0x44] ss:$8 sps:$4 sm:$0xff]  }
  0x90   :  { %1547 = vmatpush1.bf16.msra.mxu1 %v3206_v24  ;;  %1378 = vmatprep.subr.bf16.mxu0 %v3211_v25  ;;  %v3307_v24 = vld [vmem:[%s4452_s3 + $0x54] ss:$8 sps:$4 sm:$0xff]  }
  0x91   :  { %1548 = vmatprep.subr.bf16.mxu1 %v3214_v26  ;;  %v3418_v25 = vld [vmem:[%s4451_s0 + $0x18] ss:$28 sps:$4 sm:$0xff]  }
  0x92   :  { %v3305_v26 = vld [vmem:[%s4452_s3 + $0x50] ss:$8 sps:$4 sm:$0xff]  }
  0x93   :  { %1379 = vmatpush1.bf16.msra.mxu0 %v3209_v27  ;;  %v3310_v27 = vld [vmem:[%s4452_s3 + $0x64] ss:$8 sps:$4 sm:$0xff]  }
  0x94   :  { %1549 = vmatpush1.bf16.msra.mxu1 %v3212_v28  ;;  %1380 = vmatprep.subr.bf16.mxu0 %v3217_v29  ;;  %v3308_v28 = vld [vmem:[%s4452_s3 + $0x60] ss:$8 sps:$4 sm:$0xff]   ;;  %v3313_v29 = vld [vmem:[%s4452_s3 + $0x74] ss:$8 sps:$4 sm:$0xff]  }
  0x95   :  { %1550 = vmatprep.subr.bf16.mxu1 %v3220_v30 }
  0x97   :  { %1381 = vmatpush1.bf16.msra.mxu0 %v3215_v31 }
  0x98   :  { %1551 = vmatpush1.bf16.msra.mxu1 %v3218_v32  ;;  %1382 = vmatprep.subr.bf16.mxu0 %v3223_v33  ;;  %v3311_v32 = vld [vmem:[%s4452_s3 + $0x70] ss:$8 sps:$4 sm:$0xff]  }
  0x99   :  { %1552 = vmatprep.subr.bf16.mxu1 %v3226_v34  ;;  %v3316_v34 = vld [vmem:[%s4452_s3 + $0x84] ss:$8 sps:$4 sm:$0xff]  }
  0x9b   :  { %1383 = vmatpush1.bf16.msra.mxu0 %v3221_v35 }
  0x9c   :  { %1553 = vmatpush1.bf16.msra.mxu1 %v3224_v36  ;;  %1384 = vmatprep.subr.bf16.mxu0 %v3229_v37  ;;  %v3314_v36 = vld [vmem:[%s4452_s3 + $0x80] ss:$8 sps:$4 sm:$0xff]   ;;  %v3319_v37 = vld [vmem:[%s4452_s3 + $0x94] ss:$8 sps:$4 sm:$0xff]  }
  0x9d   :  { %1554 = vmatprep.subr.bf16.mxu1 %v3232_v38  ;;  %v3317_v38 = vld [vmem:[%s4452_s3 + $0x90] ss:$8 sps:$4 sm:$0xff]  }
  0x9f   :  { %1385 = vmatpush1.bf16.msra.mxu0 %v3227_v39  ;;  %v3322_v39 = vld [vmem:[%s4452_s3 + $0xa4] ss:$8 sps:$4 sm:$0xff]  }
  0xa0   :  { %1555 = vmatpush1.bf16.msra.mxu1 %v3230_v40  ;;  %1386 = vmatprep.subr.bf16.mxu0 %v3235_v41  ;;  %v3320_v40 = vld [vmem:[%s4452_s3 + $0xa0] ss:$8 sps:$4 sm:$0xff]   ;;  %v3325_v41 = vld [vmem:[%s4452_s3 + $0xb4] ss:$8 sps:$4 sm:$0xff]  }
  0xa1   :  { %1556 = vmatprep.subr.bf16.mxu1 %v3238_v42  ;;  %v3323_v42 = vld [vmem:[%s4452_s3 + $0xb0] ss:$8 sps:$4 sm:$0xff]  }
  0xa3   :  { %1387 = vmatpush1.bf16.msra.mxu0 %v3233_v43  ;;  %v3328_v43 = vld [vmem:[%s4452_s3 + $0xc4] ss:$8 sps:$4 sm:$0xff]  }
  0xa4   :  { %1557 = vmatpush1.bf16.msra.mxu1 %v3236_v44  ;;  %1388 = vmatprep.subr.bf16.mxu0 %v3241_v45  ;;  %v3326_v44 = vld [vmem:[%s4452_s3 + $0xc0] ss:$8 sps:$4 sm:$0xff]   ;;  %v3331_v45 = vld [vmem:[%s4452_s3 + $0xd4] ss:$8 sps:$4 sm:$0xff]  }
  0xa5   :  { %1558 = vmatprep.subr.bf16.mxu1 %v3244_v46  ;;  %v3329_v46 = vld [vmem:[%s4452_s3 + $0xd0] ss:$8 sps:$4 sm:$0xff]  }
  0xa7   :  { %1389 = vmatpush1.bf16.msra.mxu0 %v3239_v47  ;;  %v3334_v47 = vld [vmem:[%s4452_s3 + $0xe4] ss:$8 sps:$4 sm:$0xff]  }
  0xa8   :  { %1559 = vmatpush1.bf16.msra.mxu1 %v3242_v48  ;;  %1390 = vmatprep.subr.bf16.mxu0 %v3247_v49  ;;  %v3332_v48 = vld [vmem:[%s4452_s3 + $0xe0] ss:$8 sps:$4 sm:$0xff]   ;;  %v3337_v49 = vld [vmem:[%s4452_s3 + $0xf4] ss:$8 sps:$4 sm:$0xff]  }
  0xa9   :  { %1560 = vmatprep.subr.bf16.mxu1 %v3250_v50  ;;  %v3335_v50 = vld [vmem:[%s4452_s3 + $0xf0] ss:$8 sps:$4 sm:$0xff]  }
  0xab   :  { %1391 = vmatpush1.bf16.msra.mxu0 %v3245_v51  ;;  %v3340_v51 = vld [vmem:[%s4452_s3 + $0x104] ss:$8 sps:$4 sm:$0xff]  }
  0xac   :  { %1561 = vmatpush1.bf16.msra.mxu1 %v3248_v52  ;;  %1392 = vmatprep.subr.bf16.mxu0 %v3253_v53  ;;  %v3386_v52 = vld [vmem:[%s4453_s5 + $0x40] sm:$0xff]  }
  0xad   :  { %1562 = vmatprep.subr.bf16.mxu1 %v3256_v54  ;;  %v3387_v53 = vld [vmem:[%s4453_s5] sm:$0xff]   ;;  %v3388_v54 = vld [vmem:[%s4453_s5 + $0x48] sm:$0xff]  }
  0xaf   :  { %1393 = vmatpush1.bf16.msra.mxu0 %v3251_v55  ;;  %v3389_v55 = vld [vmem:[%s4453_s5 + $0x8] sm:$0xff]  }
  0xb0   :  { %1563 = vmatpush1.bf16.msra.mxu1 %v3254_v56  ;;  %1394 = vmatprep.subr.bf16.mxu0 %v3259_v57  ;;  %v3390_v56 = vld [vmem:[%s4453_s5 + $0x50] sm:$0xff]  }
  0xb1   :  { %1564 = vmatprep.subr.bf16.mxu1 %v3262_v58  ;;  %v3391_v57 = vld [vmem:[%s4453_s5 + $0x10] sm:$0xff]   ;;  %v3392_v58 = vld [vmem:[%s4453_s5 + $0x58] sm:$0xff]  }
  0xb3   :  { %1395 = vmatpush1.bf16.msra.mxu0 %v3257_v59  ;;  %v3393_v59 = vld [vmem:[%s4453_s5 + $0x18] sm:$0xff]  }
  0xb4   :  { %1565 = vmatpush1.bf16.msra.mxu1 %v3260_v60  ;;  %1396 = vmatprep.subr.bf16.mxu0 %v3265_v61  ;;  %v3394_v60 = vld [vmem:[%s4453_s5 + $0x60] sm:$0xff]  }
  0xb5   :  { %1566 = vmatprep.subr.bf16.mxu1 %v3268_v62  ;;  %v3395_v61 = vld [vmem:[%s4453_s5 + $0x20] sm:$0xff]   ;;  %v3396_v62 = vld [vmem:[%s4453_s5 + $0x68] sm:$0xff]  }
  0xb7   :  { %1397 = vmatpush1.bf16.msra.mxu0 %v3263_v63  ;;  %v245_v63 = vlaneseq }
  0xb8   :  { %1567 = vmatpush1.bf16.msra.mxu1 %v3266_v0  ;;  %1398 = vmatprep.subr.bf16.mxu0 %v3271_v2 }
  0xb9   :  { %1568 = vmatprep.subr.bf16.mxu1 %v3274_v3  ;;  %v4238_v0 = vshrl.u32 %v245_v63, 7  ;;  %v243_v3 = vld [vmem:[%s4454_s2] sm:$0xf]  ;;  %v3373_v63 = vld [vmem:[%s4452_s3 + $0x1b4] ss:$8 sps:$4 sm:$0xff]  }
  0xbb   :  { %1399 = vmatpush1.bf16.msra.mxu0 %v3269_v4  ;;  %v247_v2 = vsub.s32 0, %v4238_v0  ;;  %v251_v4 = vsub.s32 1, %v4238_v0 }
  0xbc   :  { %1569 = vmatpush1.bf16.msra.mxu1 %v3272_v5  ;;  %1400 = vmatprep.subr.bf16.mxu0 %v3277_v6 }
  0xbd   :  { %1570 = vmatprep.subr.bf16.mxu1 %v3280_v7  ;;  %v248_v5 = vrot.slane %v243_v3, %v247_v2  ;;  %v252_v6 = vrot.slane %v243_v3, %v251_v4 }
  0xbf   :  { %1401 = vmatpush1.bf16.msra.mxu0 %v3275_v8 }
  0xc0   :  { %1571 = vmatpush1.bf16.msra.mxu1 %v3278_v9  ;;  %2036 = vmatprep.subr.bf16.mxu0 %v3292_v10 }
  0xc1   :  { %1572 = vmatprep.subr.bf16.mxu1 %v3286_v11 }
  0xc2   :  { %1403 = vmatmul.mubr.bf16.vlgmr.msra.gmra.mrb[0].mxu0 %v3281_v12 }
  0xc3   :  { %2037 = vmatpush1.bf16.msra.mxu0 %v3290_v13 }
  0xc4   :  { %1573 = vmatpush1.bf16.msra.mxu1 %v3284_v14  ;;  %2038 = vmatprep.subr.bf16.mxu0 %v3295_v15 }
  0xc5   :  { %1585 = vmatprep.subr.bf16.mxu1 %v3289_v16 }
  0xc7   :  { %1575 = vmatmul.mubr.bf16.vlgmr.msra.gmra.mrb[4].mxu1 %v3281_v12  ;;  %2039 = vmatpush1.bf16.msra.mxu0 %v3293_v17 }
  0xc8   :  { %1586 = vmatpush1.bf16.msra.mxu1 %v3287_v18  ;;  %1617 = vmatprep.mubr.bf16.mxu1 %v3419_v1  ;;  %v3302_v1 = vld [vmem:[%s4452_s3 + $0x40] ss:$8 sps:$4 sm:$0xff]  }
  0xc9   :  { %2040 = vmatprep.subr.bf16.mxu0 %v3298_v19  ;;  %2863 = vmatprep.subr.bf16.mxu1 %v3386_v52  ;;  %v3353_v52 = vld [vmem:[%s4452_s3 + $0x150] ss:$8 sps:$4 sm:$0xff]  }
  0xcb   :  { %2041 = vmatpush1.bf16.msra.mxu0 %v3296_v20 }
  0xcc   :  { %2042 = vmatprep.subr.bf16.mxu0 %v3301_v21 }
  0xcf   :  { %2043 = vmatpush1.bf16.msra.mxu0 %v3299_v22 }
  0xd0   :  { %2044 = vmatprep.subr.bf16.mxu0 %v3304_v23 }
  0xd3   :  { %2754 = vmatmul.mubr.msk.bf16.vlgmr.msra.gmra.mrb[4].mxu1 %vm1280_vm0, %v3418_v25  ;;  %2045 = vmatpush1.bf16.msra.mxu0 %v3302_v1  ;;  %v255_v25 = vsub.s32 2, %v4238_v0 }
  0xd4   :  { %2046 = vmatprep.subr.bf16.mxu0 %v3307_v24  ;;  %2864 = vmatpush3.bf16.msra.mxu1 %v3387_v53  ;;  %v3338_v24 = vld [vmem:[%s4452_s3 + $0x100] ss:$8 sps:$4 sm:$0xff]   ;;  %v3358_v53 = vld [vmem:[%s4452_s3 + $0x164] ss:$8 sps:$4 sm:$0xff]  }
  0xd5   :  { %2865 = vmatprep.subr.bf16.mxu1 %v3388_v54  ;;  %v3356_v54 = vld [vmem:[%s4452_s3 + $0x160] ss:$8 sps:$4 sm:$0xff]  }
  0xd7   :  { %2047 = vmatpush1.bf16.msra.mxu0 %v3305_v26  ;;  %v3343_v26 = vld [vmem:[%s4452_s3 + $0x114] ss:$8 sps:$4 sm:$0xff]  }
  0xd8   :  { %2048 = vmatprep.subr.bf16.mxu0 %v3310_v27  ;;  %2866 = vmatpush3.bf16.msra.mxu1 %v3389_v55  ;;  %v259_v27 = vsub.s32 3, %v4238_v0  ;;  %v3361_v55 = vld [vmem:[%s4452_s3 + $0x174] ss:$8 sps:$4 sm:$0xff]   ;;  %v3403_v0 = vld [vmem:[%s4455_s7 + $0x8] sm:$0xff]  }
  0xd9   :  { %2867 = vmatprep.subr.bf16.mxu1 %v3390_v56  ;;  %v3359_v56 = vld [vmem:[%s4452_s3 + $0x170] ss:$8 sps:$4 sm:$0xff]  }
  0xda   :  { %v4143_v30 = vpop.f32.mrb[0].mxu1 }
  0xdb   :  { %v4145_v31 = vpop.f32.mrb[1].mxu1  ;;  %2049 = vmatpush1.bf16.msra.mxu0 %v3308_v28  ;;  %v256_v28 = vrot.slane %v243_v3, %v255_v25 }
  0xdc   :  { %v4150_v33 = vpop.f32.mrb[2].mxu1  ;;  %2050 = vmatprep.subr.bf16.mxu0 %v3313_v29  ;;  %2868 = vmatpush3.bf16.msra.mxu1 %v3391_v57  ;;  %v3341_v29 = vld [vmem:[%s4452_s3 + $0x110] ss:$8 sps:$4 sm:$0xff]   ;;  %v3364_v57 = vld [vmem:[%s4452_s3 + $0x184] ss:$8 sps:$4 sm:$0xff]  }
  0xdd   :  { %v4155_v35 = vpop.f32.mrb[3].mxu1  ;;  %2869 = vmatprep.subr.bf16.mxu1 %v3392_v58  ;;  %v3362_v58 = vld [vmem:[%s4452_s3 + $0x180] ss:$8 sps:$4 sm:$0xff]  }
  0xdf   :  { %2051 = vmatpush1.bf16.msra.mxu0 %v3311_v32 }
  0xe0   :  { %2052 = vmatprep.subr.bf16.mxu0 %v3316_v34  ;;  %2870 = vmatpush3.bf16.msra.mxu1 %v3393_v59  ;;  %v3367_v59 = vld [vmem:[%s4452_s3 + $0x194] ss:$8 sps:$4 sm:$0xff]  }
  0xe1   :  { %2871 = vmatprep.subr.bf16.mxu1 %v3394_v60  ;;  %v3365_v60 = vld [vmem:[%s4452_s3 + $0x190] ss:$8 sps:$4 sm:$0xff]  }
  0xe3   :  { %2053 = vmatpush1.bf16.msra.mxu0 %v3314_v36 }
  0xe4   :  { %2054 = vmatprep.subr.bf16.mxu0 %v3319_v37  ;;  %2872 = vmatpush3.bf16.msra.mxu1 %v3395_v61  ;;  %v3370_v61 = vld [vmem:[%s4452_s3 + $0x1a4] ss:$8 sps:$4 sm:$0xff]  }
  0xe5   :  { %2873 = vmatprep.subr.bf16.mxu1 %v3396_v62  ;;  %v3368_v62 = vld [vmem:[%s4452_s3 + $0x1a0] ss:$8 sps:$4 sm:$0xff]  }
  0xe7   :  { %2055 = vmatpush1.bf16.msra.mxu0 %v3317_v38  ;;  %v3349_v38 = vld [vmem:[%s4452_s3 + $0x134] ss:$8 sps:$4 sm:$0xff]  }
  0xe8   :  { %2056 = vmatprep.subr.bf16.mxu0 %v3322_v39 }
  0xeb   :  { %2057 = vmatpush1.bf16.msra.mxu0 %v3320_v40 }
  0xec   :  { %2058 = vmatprep.subr.bf16.mxu0 %v3325_v41 }
  0xef   :  { %2059 = vmatpush1.bf16.msra.mxu0 %v3323_v42 }
  0xf0   :  { %2060 = vmatprep.subr.bf16.mxu0 %v3328_v43 }
  0xf3   :  { %2061 = vmatpush1.bf16.msra.mxu0 %v3326_v44  ;;  %v3347_v44 = vld [vmem:[%s4452_s3 + $0x130] ss:$8 sps:$4 sm:$0xff]  }
  0xf4   :  { %2062 = vmatprep.subr.bf16.mxu0 %v3331_v45 }
  0xf7   :  { %2063 = vmatpush1.bf16.msra.mxu0 %v3329_v46 }
  0xf8   :  { %2064 = vmatprep.subr.bf16.mxu0 %v3334_v47  ;;  %v3352_v47 = vld [vmem:[%s4452_s3 + $0x144] ss:$8 sps:$4 sm:$0xff]  }
  0xfb   :  { %2065 = vmatpush1.bf16.msra.mxu0 %v3332_v48 }
  0xfc   :  { %2066 = vmatprep.subr.bf16.mxu0 %v3337_v49 }
  0xff   :  { %2067 = vmatpush1.bf16.msra.mxu0 %v3335_v50  ;;  %v3350_v50 = vld [vmem:[%s4452_s3 + $0x140] ss:$8 sps:$4 sm:$0xff]  }
 0x100   :  { %2079 = vmatprep.subr.bf16.mxu0 %v3340_v51  ;;  %v3355_v51 = vld [vmem:[%s4452_s3 + $0x154] ss:$8 sps:$4 sm:$0xff]  }
 0x195   :  { %v1404_v7 = vpop.f32.mrb[0].mxu0 }
 0x196   :  { %v2943_v8 = vadd.f32 %v1404_v7, %v248_v5  ;;  %v1406_v9 = vpop.f32.mrb[1].mxu0  ;;  %v3379_v7 = vld [vmem:[%s4452_s3 + $0x1d4] ss:$8 sps:$4 sm:$0xff]  }
 0x197   :  { %v2945_v10 = vadd.f32 %v1406_v9, %v252_v6  ;;  %v1408_v11 = vpop.f32.mrb[2].mxu0  ;;  %v3382_v9 = vld [vmem:[%s4452_s3 + $0x1e4] ss:$8 sps:$4 sm:$0xff]  }
 0x198   :  { %v2944_v12 = vadd.f32 %v2943_v8, %v4143_v30  ;;  %v2947_v13 = vadd.f32 %v1408_v11, %v248_v5  ;;  %v1410_v14 = vpop.f32.mrb[3].mxu0  ;;  %v260_v30 = vrot.slane %v243_v3, %v259_v27  ;;  %v3371_v3 = vld [vmem:[%s4452_s3 + $0x1b0] ss:$8 sps:$4 sm:$0xff]   ;;  %v3376_v5 = vld [vmem:[%s4452_s3 + $0x1c4] ss:$8 sps:$4 sm:$0xff]  }
 0x199   :  { %v2946_v15 = vadd.f32 %v2945_v10, %v4145_v31  ;;  %v2949_v16 = vadd.f32 %v1410_v14, %v252_v6  ;;  %v3346_v31 = vld [vmem:[%s4452_s3 + $0x124] ss:$8 sps:$4 sm:$0xff]   ;;  %v3374_v6 = vld [vmem:[%s4452_s3 + $0x1c0] ss:$8 sps:$4 sm:$0xff]   ;;  %v3377_v8 = vld [vmem:[%s4452_s3 + $0x1d0] ss:$8 sps:$4 sm:$0xff]  }
 0x19a   :  { %v2948_v17 = vadd.f32 %v2947_v13, %v4150_v33  ;;  %v1628_v19 = vmax.f32 %v2944_v12, 0.0  ;;  %v3380_v10 = vld [vmem:[%s4452_s3 + $0x1e0] ss:$8 sps:$4 sm:$0xff]   ;;  %v3385_v11 = vld [vmem:[%s4452_s3 + $0x1f4] ss:$8 sps:$4 sm:$0xff]  }
 0x19b   :  { %v2950_v18 = vadd.f32 %v2949_v16, %v4155_v35  ;;  %v1629_v21 = vmax.f32 %v2946_v15, 0.0  ;;  %v3344_v35 = vld [vmem:[%s4452_s3 + $0x120] ss:$8 sps:$4 sm:$0xff]   ;;  %v3383_v12 = vld [vmem:[%s4452_s3 + $0x1f0] ss:$8 sps:$4 sm:$0xff]  }
 0x19c   :  { %v1632_v20 = vmax.f32 %v2948_v17, 0.0  ;;  %v3397_v13 = vld [vmem:[%s4453_s5 + $0x28] sm:$0xff]   ;;  %v3398_v14 = vld [vmem:[%s4453_s5 + $0x70] sm:$0xff]   ;;  %v3400_v16 = vld [vmem:[%s4453_s5 + $0x78] sm:$0xff]  }
 0x19d   :  { %v1633_v22 = vmax.f32 %v2950_v18, 0.0  ;;  %2874 = vmatpush3.bf16.msra.mxu1 %v3397_v13  ;;  %v3399_v15 = vld [vmem:[%s4453_s5 + $0x30] sm:$0xff]   ;;  %v3401_v17 = vld [vmem:[%s4453_s5 + $0x38] sm:$0xff]   ;;  %v3420_v18 = vmov 0.0  }
 0x19e   :  { %v1636_v23 = vpack.c.bf16 %v1632_v20, %v1628_v19  ;;  %2875 = vmatprep.subr.bf16.mxu1 %v3398_v14  ;;  %v1704_v19 = vld [vmem:[%s4456_s4] sm:$0x3] }
 0x19f   :  { %v1637_v1 = vpack.c.bf16 %v1633_v22, %v1629_v21  ;;  %v1709_v20 = vrot.slane %v1704_v19, %v247_v2  ;;  %v1713_v21 = vrot.slane %v1704_v19, %v251_v4  ;;  %v3402_v2 = vld [vmem:[%s4455_s7] sm:$0xff]   ;;  %v3404_v4 = vld [vmem:[%s4455_s7 + $0x10] sm:$0xff]  }
 0x1a1   :  { %2068 = vmatprep.mubr.bf16.mxu0 %v1637_v1  ;;  %2876 = vmatpush3.bf16.msra.mxu1 %v3399_v15 }
 0x1a2   :  { %2069 = vmatmul.mubr.bf16.vlgmr.msra.gmra.mrb[4].mxu0 %v1636_v23  ;;  %2877 = vmatprep.subr.bf16.mxu1 %v3400_v16 }
 0x1a3   :  { %2080 = vmatpush1.bf16.msra.mxu0 %v3338_v24 }
 0x1a4   :  { %2081 = vmatprep.subr.bf16.mxu0 %v3343_v26 }
 0x1a5   :  { %2878 = vmatpush3.bf16.msra.mxu1 %v3401_v17 }
 0x1a6   :  { %v1619_v32 = vpop.f32.mrb[4].mxu1  ;;  %2903 = vmatprep.subr.bf16.mxu1 %v3420_v18 }
 0x1a7   :  { %v2951_v33 = vadd.f32 %v1619_v32, %v256_v28  ;;  %v1621_v34 = vpop.f32.mrb[5].mxu1  ;;  %2082 = vmatpush1.bf16.msra.mxu0 %v3341_v29 }
 0x1a8   :  { %v2952_v36 = vadd.f32 %v1621_v34, %v260_v30  ;;  %v1623_v37 = vpop.f32.mrb[6].mxu1  ;;  %2083 = vmatprep.subr.bf16.mxu0 %v3346_v31 }
 0x1a9   :  { %v2953_v39 = vadd.f32 %v1623_v37, %v256_v28  ;;  %v1625_v40 = vpop.f32.mrb[7].mxu1  ;;  %v1630_v42 = vmax.f32 %v2951_v33, 0.0  ;;  %v3407_v37 = vld [vmem:[%s4455_s7 + $0x28] sm:$0xff]  }
 0x1aa   :  { %v2954_v41 = vadd.f32 %v1625_v40, %v260_v30  ;;  %v1631_v45 = vmax.f32 %v2952_v36, 0.0  ;;  %v3406_v36 = vld [vmem:[%s4455_s7 + $0x20] sm:$0xff]  }
 0x1ab   :  { %v1634_v43 = vmax.f32 %v2953_v39, 0.0  ;;  %2084 = vmatpush1.bf16.msra.mxu0 %v3344_v35  ;;  %v3405_v35 = vld [vmem:[%s4455_s7 + $0x18] sm:$0xff]  }
 0x1ac   :  { %v1635_v46 = vmax.f32 %v2954_v41, 0.0  ;;  %2085 = vmatprep.subr.bf16.mxu0 %v3349_v38  ;;  %v3408_v38 = vld [vmem:[%s4455_s7 + $0x30] sm:$0xff]   ;;  %v3409_v39 = vld [vmem:[%s4455_s7 + $0x38] sm:$0xff]   ;;  %v2819_v41 = vld [vmem:[%s4458_s6] ss:$0 sm:$0xff] }
 0x1ad   :  { %v1638_v48 = vpack.c.bf16 %v1634_v43, %v1630_v42 }
 0x1ae   :  { %v1639_v49 = vpack.c.bf16 %v1635_v46, %v1631_v45 }
 0x1af   :  { %2086 = vmatpush1.bf16.msra.mxu0 %v3347_v44 }
 0x1b0   :  { %2111 = vmatprep.mubr.bf16.mxu0 %v1639_v49  ;;  %2087 = vmatprep.subr.bf16.mxu0 %v3352_v47 }
 0x1b3   :  { %2088 = vmatpush1.bf16.msra.mxu0 %v3350_v50 }
 0x1b4   :  { %2089 = vmatprep.subr.bf16.mxu0 %v3355_v51  ;;  %v3410_v51 = vld [vmem:[%s4457_s9] sm:$0xff]  }
 0x1b7   :  { %2090 = vmatpush1.bf16.msra.mxu0 %v3353_v52 }
 0x1b8   :  { %2091 = vmatprep.subr.bf16.mxu0 %v3358_v53  ;;  %v3411_v53 = vld [vmem:[%s4457_s9 + $0x8] sm:$0xff]  }
 0x1bb   :  { %2092 = vmatpush1.bf16.msra.mxu0 %v3356_v54  ;;  %v3412_v54 = vld [vmem:[%s4457_s9 + $0x10] sm:$0xff]  }
 0x1bc   :  { %2093 = vmatprep.subr.bf16.mxu0 %v3361_v55  ;;  %v3413_v55 = vld [vmem:[%s4457_s9 + $0x18] sm:$0xff]  }
 0x1bf   :  { %2094 = vmatpush1.bf16.msra.mxu0 %v3359_v56  ;;  %v3414_v56 = vld [vmem:[%s4457_s9 + $0x20] sm:$0xff]  }
 0x1c0   :  { %2095 = vmatprep.subr.bf16.mxu0 %v3364_v57  ;;  %v3415_v57 = vld [vmem:[%s4457_s9 + $0x28] sm:$0xff]  }
 0x1c3   :  { %2096 = vmatpush1.bf16.msra.mxu0 %v3362_v58  ;;  %v3416_v58 = vld [vmem:[%s4457_s9 + $0x30] sm:$0xff]  }
 0x1c4   :  { %2097 = vmatprep.subr.bf16.mxu0 %v3367_v59  ;;  %v3417_v59 = vld [vmem:[%s4457_s9 + $0x38] sm:$0xff]  }
 0x1c7   :  { %2098 = vmatpush1.bf16.msra.mxu0 %v3365_v60  ;;  %v2836_v60 = vld [vmem:[%s4459_s8] ss:$0 sm:$0xff] }
 0x1c8   :  { %2099 = vmatprep.subr.bf16.mxu0 %v3370_v61 }
 0x1cb   :  { %2100 = vmatpush1.bf16.msra.mxu0 %v3368_v62 }
 0x1cc   :  { %2101 = vmatprep.subr.bf16.mxu0 %v3373_v63 }
 0x1cf   :  { %2102 = vmatpush1.bf16.msra.mxu0 %v3371_v3 }
 0x1d0   :  { %2103 = vmatprep.subr.bf16.mxu0 %v3376_v5 }
 0x1d3   :  { %2104 = vmatpush1.bf16.msra.mxu0 %v3374_v6 }
 0x1d4   :  { %2105 = vmatprep.subr.bf16.mxu0 %v3379_v7 }
 0x1d7   :  { %2106 = vmatpush1.bf16.msra.mxu0 %v3377_v8 }
 0x1d8   :  { %2107 = vmatprep.subr.bf16.mxu0 %v3382_v9 }
 0x1db   :  { %2108 = vmatpush1.bf16.msra.mxu0 %v3380_v10  ;;  %v2845_v10 = vld [vmem:[%s4460_s10] ss:$0 sm:$0xff] }
 0x1dc   :  { %2109 = vmatprep.subr.bf16.mxu0 %v3385_v11 }
 0x1df   :  { %2110 = vmatpush1.bf16.msra.mxu0 %v3383_v12 }
 0x1e2   :  { %2112 = vmatmul.mubr.bf16.vlgmr.msra.gmra.mrb[4].mxu0 %v1638_v48 }
 0x2b5   :  { %v2113_v22 = vpop.f32.mrb[4].mxu0 }
 0x2b6   :  { %v2955_v23 = vadd.f32 %v2113_v22, %v1709_v20  ;;  %v2115_v1 = vpop.f32.mrb[5].mxu0 }
 0x2b7   :  { %v2956_v24 = vadd.f32 %v2115_v1, %v1713_v21  ;;  %v2117_v25 = vpop.f32.mrb[6].mxu0 }
 0x2b8   :  { %v2957_v26 = vadd.f32 %v2117_v25, %v1709_v20  ;;  %v2119_v27 = vpop.f32.mrb[7].mxu0  ;;  %v2122_v29 = vmax.f32 %v2955_v23, 0.0 }
 0x2b9   :  { %v2958_v28 = vadd.f32 %v2119_v27, %v1713_v21  ;;  %v2123_v31 = vmax.f32 %v2956_v24, 0.0 }
 0x2ba   :  { %v2124_v30 = vmax.f32 %v2957_v26, 0.0 }
 0x2bb   :  { %v2125_v32 = vmax.f32 %v2958_v28, 0.0 }
 0x2bc   :  { %v2126_v33 = vpack.c.bf16 %v2124_v30, %v2122_v29 }
 0x2bd   :  { %v2127_v34 = vpack.c.bf16 %v2125_v32, %v2123_v31 }
 0x2bf   :  { %2295 = vmatprep.mubr.bf16.mxu1 %v2127_v34 }
 0x2c0   :  { %2296 = vmatmul.mubr.bf16.vlgmr.msra.gmra.mrb[8].mxu1 %v2126_v33 }
 0x2c1   :  { %2904 = vmatpush3.bf16.msra.mxu1 %v3402_v2  ;;  %2919 = vmatprep.mubr.msk.bf16.mxu1 %vm3421_vm1, %v3420_v18 }
 0x2c2   :  { %2905 = vmatprep.subr.bf16.mxu1 %v3420_v18 }
 0x2c5   :  { %2906 = vmatpush3.bf16.msra.mxu1 %v3403_v0 }
 0x2c6   :  { %2907 = vmatprep.subr.bf16.mxu1 %v3420_v18 }
 0x2c9   :  { %2908 = vmatpush3.bf16.msra.mxu1 %v3404_v4 }
 0x2ca   :  { %2909 = vmatprep.subr.bf16.mxu1 %v3420_v18 }
 0x2cd   :  { %2910 = vmatpush3.bf16.msra.mxu1 %v3405_v35 }
 0x2ce   :  { %2911 = vmatprep.subr.bf16.mxu1 %v3420_v18 }
 0x2d1   :  { %2912 = vmatpush3.bf16.msra.mxu1 %v3406_v36 }
 0x2d2   :  { %2913 = vmatprep.subr.bf16.mxu1 %v3420_v18 }
 0x2d5   :  { %2914 = vmatpush3.bf16.msra.mxu1 %v3407_v37 }
 0x2d6   :  { %2915 = vmatprep.subr.bf16.mxu1 %v3420_v18 }
 0x2d9   :  { %2916 = vmatpush3.bf16.msra.mxu1 %v3408_v38 }
 0x2da   :  { %2917 = vmatprep.subr.bf16.mxu1 %v3420_v18 }
 0x2dd   :  { %2918 = vmatpush3.bf16.msra.mxu1 %v3409_v39 }
 0x2de   :  { %2923 = vmatprep.subr.bf16.mxu1 %v3420_v18 }
 0x393   :  { %v2879_v40 = vpop.f32.mrb[8].mxu1 }
 0x394   :  { %v2880_v42 = vpop.f32.mrb[9].mxu1 }
 0x395   :  { %v2881_v43 = vadd.f32 %v2880_v42, %v2879_v40  ;;  %v2882_v44 = vpop.f32.mrb[10].mxu1 }
 0x396   :  { %v2883_v45 = vpop.f32.mrb[11].mxu1 }
 0x397   :  { %v2298_v46 = vadd.f32 %v2881_v43, %v2819_v41  ;;  %v2884_v47 = vadd.f32 %v2883_v45, %v2882_v44 }
 0x399   :  { %v2301_v48 = vadd.f32 %v2884_v47, %v2819_v41  ;;  %v2304_v49 = vmax.f32 %v2298_v46, 0.0 }
 0x39b   :  { %v2305_v50 = vmax.f32 %v2301_v48, 0.0 }
 0x39d   :  { %v2306_v52 = vpack.c.bf16 %v2305_v50, %v2304_v49 }
 0x39f   :  { %2920 = vmatmul.mubr.bf16.vlgmr.msra.gmra.mrb[12].mxu1 %v2306_v52 }
 0x3a0   :  { %2924 = vmatpush3.bf16.msra.mxu1 %v3410_v51  ;;  %2939 = vmatprep.mubr.msk.bf16.mxu1 %vm3421_vm1, %v3420_v18 }
 0x3a1   :  { %2925 = vmatprep.subr.bf16.mxu1 %v3420_v18 }
 0x3a4   :  { %2926 = vmatpush3.bf16.msra.mxu1 %v3411_v53 }
 0x3a5   :  { %2927 = vmatprep.subr.bf16.mxu1 %v3420_v18 }
 0x3a8   :  { %2928 = vmatpush3.bf16.msra.mxu1 %v3412_v54 }
 0x3a9   :  { %2929 = vmatprep.subr.bf16.mxu1 %v3420_v18 }
 0x3ac   :  { %2930 = vmatpush3.bf16.msra.mxu1 %v3413_v55 }
 0x3ad   :  { %2931 = vmatprep.subr.bf16.mxu1 %v3420_v18 }
 0x3b0   :  { %2932 = vmatpush3.bf16.msra.mxu1 %v3414_v56 }
 0x3b1   :  { %2933 = vmatprep.subr.bf16.mxu1 %v3420_v18 }
 0x3b4   :  { %2934 = vmatpush3.bf16.msra.mxu1 %v3415_v57 }
 0x3b5   :  { %2935 = vmatprep.subr.bf16.mxu1 %v3420_v18 }
 0x3b8   :  { %2936 = vmatpush3.bf16.msra.mxu1 %v3416_v58 }
 0x3b9   :  { %2937 = vmatprep.subr.bf16.mxu1 %v3420_v18 }
 0x3bc   :  { %2938 = vmatpush3.bf16.msra.mxu1 %v3417_v59 }
 0x472   :  { %v2412_v61 = vpop.f32.mrb[12].mxu1 }
 0x473   :  { %v2413_v62 = vadd.f32 %v2836_v60, %v2412_v61  ;;  %v2921_v63 = vpop.f32.mrb[13].mxu1 }
 0x474   :  { %v2415_v3 = vpop.f32.mrb[14].mxu1 }
 0x475   :  { %v2416_v5 = vadd.f32 %v2836_v60, %v2415_v3  ;;  %v2922_v6 = vpop.f32.mrb[15].mxu1  ;;  %v2419_v7 = vmax.f32 %v2413_v62, 0.0 }
 0x477   :  { %v2420_v8 = vmax.f32 %v2416_v5, 0.0 }
 0x479   :  { %v2421_v9 = vpack.c.bf16 %v2420_v8, %v2419_v7 }
 0x47b   :  { %2940 = vmatmul.mubr.bf16.vlgmr.msra.gmra.mrb[16].mxu1 %v2421_v9 }
 0x54e   :  { %v2527_v11 = vpop.f32.mrb[16].mxu1 }
 0x54f   :  { %v2528_v12 = vadd.f32 %v2845_v10, %v2527_v11  ;;  %v2941_v13 = vpop.f32.mrb[17].mxu1 }
 0x550   :  { %v2530_v14 = vpop.f32.mrb[18].mxu1 }
 0x551   :  { %v2531_v15 = vadd.f32 %v2845_v10, %v2530_v14  ;;  %v2942_v16 = vpop.f32.mrb[19].mxu1  ;;  %v2534_v17 = vmax.f32 %v2528_v12, 0.0 }
 0x553   :  { %v2535_v18 = vmax.f32 %v2531_v15, 0.0 }
 0x555   :  { %v2861_v19 = vpack.c.bf16 %v2535_v18, %v2534_v17 }
 0x557   :  { %2862 = vst [vmem:[%s4461_s11] sm:$0xff] %v2861_v19  }

</bundles_post_ra>
